<compile_context>
chip_gen: v5e
topology: v5e:2x2
jax: 0.10.0
libtpu: 0.0.40
codegen_flags: <defaults>
</compile_context>

<pallas_src>
import functools

import jax
import jax.numpy as jnp
from jax.experimental import pallas as pl
from jax.experimental.pallas import tpu as pltpu


def _round_up(x, m):
    return ((x + m - 1) // m) * m


# ---------------------------------------------------------------------------
# Pallas kernel: fused (im2col-free) conv for one image via tap accumulation.
# ---------------------------------------------------------------------------
def _conv_tap_kernel(x_ref, w_ref, b_ref, o_ref, *, kh, kw, w_in, m_out):
    # x_ref: (1, HW_pad, C)     bf16  flattened NHWC image (+ zero tail)
    # w_ref: (KH*KW, C, O_pad)  bf16  per-tap weight slabs (VMEM-resident)
    # b_ref: (1, O_pad)         f32   zero-padded bias
    # o_ref: (1, M_OUT, O_pad)  f32   stride-1 conv output, pseudo rows i*W + j
    o_pad = o_ref.shape[-1]

    # Fold the bias into the accumulator init.
    acc = jnp.broadcast_to(b_ref[...], (m_out, o_pad)).astype(jnp.float32)

    # For tap (ki, kj) the required input rows of the flattened image form a
    # single contiguous slab starting at offset ki*W + kj, so each tap is an
    # offset load + one MXU matmul contracting over C, accumulated in f32.
    for t in range(kh * kw):
        ki, kj = divmod(t, kw)
        off = ki * w_in + kj
        tap = x_ref[0, off:off + m_out, :]                      # (M_OUT, C) bf16
        acc = acc + jnp.dot(tap, w_ref[t],
                            preferred_element_type=jnp.float32)

    o_ref[0] = acc.astype(o_ref.dtype)


# ---------------------------------------------------------------------------
# Wrapper: NCHW in / NCHW out, matching the PyTorch module's forward.
# ---------------------------------------------------------------------------
@functools.partial(jax.jit, static_argnames=("stride",))
def resnet9_cutlass_forward(x, weight, bias, *, stride=1):
    """x: (N, C, H, W), weight: (O, C, KH, KW), bias: (O,) -> (N, O, OH, OW)."""
    n, c, h, w_sp = x.shape
    o, _, kh, kw = weight.shape

    # The kernel computes the stride-1 conv; stride > 1 is applied by exact
    # subsampling in the wrapper (a no-op for the module's default stride=1).
    # TODO(synk): for large strides, push the stride into the tap offsets
    # instead of subsampling to avoid redundant compute.
    oh1 = h - kh + 1
    ow1 = w_sp - kw + 1

    compute_dtype = jnp.bfloat16              # MXU-native operands, f32 accum
    o_pad = _round_up(max(o, 1), 128)         # lane-dense output (full 128 lanes)
    m_out = oh1 * w_sp                        # pseudo rows: full width, cropped later
    hw_pad = _round_up(h * w_sp + kw - 1, 8)  # zero tail so every tap slab fits

    # NCHW -> NHWC -> (N, H*W, C); 1x traffic, no K*K im2col expansion.
    xf = jnp.transpose(x, (0, 2, 3, 1)).reshape(n, h * w_sp, c)
    xf = jnp.pad(xf, ((0, 0), (0, hw_pad - h * w_sp), (0, 0)))
    xf = xf.astype(compute_dtype)

    # OIHW -> (KH*KW, C, O_pad), zero-padded along O for lane-dense stores.
    w_taps = jnp.transpose(weight, (2, 3, 1, 0)).reshape(kh * kw, c, o)
    w_taps = jnp.pad(w_taps, ((0, 0), (0, 0), (0, o_pad - o)))
    w_taps = w_taps.astype(compute_dtype)

    b_pad = jnp.pad(bias.astype(jnp.float32), (0, o_pad - o)).reshape(1, o_pad)

    kernel = functools.partial(
        _conv_tap_kernel, kh=kh, kw=kw, w_in=w_sp, m_out=m_out)

    out = pl.pallas_call(
        kernel,
        out_shape=jax.ShapeDtypeStruct((n, m_out, o_pad), jnp.float32),
        grid_spec=pltpu.PrefetchScalarGridSpec(
            num_scalar_prefetch=0,
            grid=(n,),  # one image per step; "parallel" -> megacore sharding
            in_specs=[
                pl.BlockSpec((1, hw_pad, c), lambda i: (i, 0, 0)),
                pl.BlockSpec((kh * kw, c, o_pad), lambda i: (0, 0, 0)),
                pl.BlockSpec((1, o_pad), lambda i: (0, 0)),
            ],
            out_specs=pl.BlockSpec((1, m_out, o_pad), lambda i: (i, 0, 0)),
        ),
        compiler_params=pltpu.CompilerParams(
            dimension_semantics=("parallel",),
        ),
    )(xf, w_taps, b_pad)

    # (N, OH1*W, O_pad) -> (N, OH1, W, O_pad); drop the wrapped columns and the
    # O padding, apply the stride by subsampling, and return NCHW.
    out = out.reshape(n, oh1, w_sp, o_pad)
    out = out[:, ::stride, :ow1:stride, :o]
    out = jnp.transpose(out, (0, 3, 1, 2)).astype(x.dtype)
    return out


if __name__ == "__main__":
    key = jax.random.PRNGKey(0)
    kx, kw_key = jax.random.split(key)

    N, C, H, W = 2, 4, 16, 16
    O, K, STRIDE = 8, 3, 1

    x = jax.random.normal(kx, (N, C, H, W), dtype=jnp.float32)
    weight = jax.random.normal(kw_key, (O, C, K, K), dtype=jnp.float32)  # randn
    bias = jnp.zeros((O,), dtype=jnp.float32)                            # zeros

    out = resnet9_cutlass_forward(x, weight, bias, stride=STRIDE)
    out = jax.block_until_ready(out)

    # Reference: the same bf16-quantized operands through XLA's conv in f32
    # (the kernel feeds the MXU bf16 operands with f32 accumulation, so with
    # pre-quantized inputs the two paths agree up to summation order).
    xq = x.astype(jnp.bfloat16).astype(jnp.float32)
    wq = weight.astype(jnp.bfloat16).astype(jnp.float32)
    ref = jax.lax.conv_general_dilated(
        xq, wq, window_strides=(STRIDE, STRIDE), padding="VALID",
        dimension_numbers=("NCHW", "OIHW", "NCHW"),
        precision=jax.lax.Precision.HIGHEST,
    ) + bias.reshape(1, -1, 1, 1)
    assert out.shape == ref.shape, (out.shape, ref.shape)
    assert jnp.allclose(out, ref, atol=5e-3, rtol=5e-3), float(
        jnp.max(jnp.abs(out - ref)))

    print("KERNEL_OK")
</pallas_src>

<mosaic_0001>
module attributes {stable_mosaic.version = 11 : i64} {
  func.func @_conv_tap_kernel(%arg0: i32, %arg1: memref<1x264x4xbf16, #tpu.memory_space<vmem>>, %arg2: memref<9x4x128xbf16, #tpu.memory_space<vmem>>, %arg3: memref<1x128xf32, #tpu.memory_space<vmem>>, %arg4: memref<1x224x128xf32, #tpu.memory_space<vmem>>) attributes {dimension_semantics = [#tpu.dimension_semantics<parallel>], iteration_bounds = array<i64: 2>, scalar_prefetch = 0 : i64, scratch_operands = 0 : i64, tpu.core_type = #tpu.core_type<tc>, window_params = [{transform_indices = @transform_0, window_bounds = array<i64: 1, 264, 4>}, {pipeline_mode = #tpu.pipeline_mode<synchronous>, transform_indices = @transform_1, window_bounds = array<i64: 9, 4, 128>}, {pipeline_mode = #tpu.pipeline_mode<synchronous>, transform_indices = @transform_2, window_bounds = array<i64: 1, 128>}, {transform_indices = @transform_3, window_bounds = array<i64: 1, 224, 128>}]} {
    %c0 = arith.constant 0 : index
    %c0_0 = arith.constant 0 : index
    %0 = vector.load %arg3[%c0, %c0_0] : memref<1x128xf32, #tpu.memory_space<vmem>>, vector<1x128xf32>
    %1 = vector.shape_cast %0 : vector<1x128xf32> to vector<1x128xf32>
    %2 = vector.broadcast %1 : vector<1x128xf32> to vector<224x128xf32>
    %c0_1 = arith.constant 0 : index
    %c0_2 = arith.constant 0 : index
    %c0_3 = arith.constant 0 : index
    %3 = vector.load %arg1[%c0_1, %c0_2, %c0_3] : memref<1x264x4xbf16, #tpu.memory_space<vmem>>, vector<1x224x4xbf16>
    %4 = vector.shape_cast %3 : vector<1x224x4xbf16> to vector<224x4xbf16>
    %c0_4 = arith.constant 0 : index
    %c0_5 = arith.constant 0 : index
    %c0_6 = arith.constant 0 : index
    %5 = vector.load %arg2[%c0_4, %c0_5, %c0_6] : memref<9x4x128xbf16, #tpu.memory_space<vmem>>, vector<1x4x128xbf16>
    %6 = vector.shape_cast %5 : vector<1x4x128xbf16> to vector<4x128xbf16>
    %cst = arith.constant dense<0.000000e+00> : vector<224x128xf32>
    %7 = tpu.matmul %4, %6, %cst {dimension_numbers = #tpu.dot_dimension_numbers<[1], [0], [0], [1], [0, 0, 1, 1], [], []>} : vector<224x4xbf16>, vector<4x128xbf16>, vector<224x128xf32> -> vector<224x128xf32>
    %8 = arith.addf %2, %7 : vector<224x128xf32>
    %c0_7 = arith.constant 0 : index
    %c1 = arith.constant 1 : index
    %c0_8 = arith.constant 0 : index
    %9 = vector.load %arg1[%c0_7, %c1, %c0_8] : memref<1x264x4xbf16, #tpu.memory_space<vmem>>, vector<1x224x4xbf16>
    %10 = vector.shape_cast %9 : vector<1x224x4xbf16> to vector<224x4xbf16>
    %c1_9 = arith.constant 1 : index
    %c0_10 = arith.constant 0 : index
    %c0_11 = arith.constant 0 : index
    %11 = vector.load %arg2[%c1_9, %c0_10, %c0_11] : memref<9x4x128xbf16, #tpu.memory_space<vmem>>, vector<1x4x128xbf16>
    %12 = vector.shape_cast %11 : vector<1x4x128xbf16> to vector<4x128xbf16>
    %cst_12 = arith.constant dense<0.000000e+00> : vector<224x128xf32>
    %13 = tpu.matmul %10, %12, %cst_12 {dimension_numbers = #tpu.dot_dimension_numbers<[1], [0], [0], [1], [0, 0, 1, 1], [], []>} : vector<224x4xbf16>, vector<4x128xbf16>, vector<224x128xf32> -> vector<224x128xf32>
    %14 = arith.addf %8, %13 : vector<224x128xf32>
    %c0_13 = arith.constant 0 : index
    %c2 = arith.constant 2 : index
    %c0_14 = arith.constant 0 : index
    %15 = vector.load %arg1[%c0_13, %c2, %c0_14] : memref<1x264x4xbf16, #tpu.memory_space<vmem>>, vector<1x224x4xbf16>
    %16 = vector.shape_cast %15 : vector<1x224x4xbf16> to vector<224x4xbf16>
    %c2_15 = arith.constant 2 : index
    %c0_16 = arith.constant 0 : index
    %c0_17 = arith.constant 0 : index
    %17 = vector.load %arg2[%c2_15, %c0_16, %c0_17] : memref<9x4x128xbf16, #tpu.memory_space<vmem>>, vector<1x4x128xbf16>
    %18 = vector.shape_cast %17 : vector<1x4x128xbf16> to vector<4x128xbf16>
    %cst_18 = arith.constant dense<0.000000e+00> : vector<224x128xf32>
    %19 = tpu.matmul %16, %18, %cst_18 {dimension_numbers = #tpu.dot_dimension_numbers<[1], [0], [0], [1], [0, 0, 1, 1], [], []>} : vector<224x4xbf16>, vector<4x128xbf16>, vector<224x128xf32> -> vector<224x128xf32>
    %20 = arith.addf %14, %19 : vector<224x128xf32>
    %c0_19 = arith.constant 0 : index
    %c16 = arith.constant 16 : index
    %c0_20 = arith.constant 0 : index
    %21 = vector.load %arg1[%c0_19, %c16, %c0_20] : memref<1x264x4xbf16, #tpu.memory_space<vmem>>, vector<1x224x4xbf16>
    %22 = vector.shape_cast %21 : vector<1x224x4xbf16> to vector<224x4xbf16>
    %c3 = arith.constant 3 : index
    %c0_21 = arith.constant 0 : index
    %c0_22 = arith.constant 0 : index
    %23 = vector.load %arg2[%c3, %c0_21, %c0_22] : memref<9x4x128xbf16, #tpu.memory_space<vmem>>, vector<1x4x128xbf16>
    %24 = vector.shape_cast %23 : vector<1x4x128xbf16> to vector<4x128xbf16>
    %cst_23 = arith.constant dense<0.000000e+00> : vector<224x128xf32>
    %25 = tpu.matmul %22, %24, %cst_23 {dimension_numbers = #tpu.dot_dimension_numbers<[1], [0], [0], [1], [0, 0, 1, 1], [], []>} : vector<224x4xbf16>, vector<4x128xbf16>, vector<224x128xf32> -> vector<224x128xf32>
    %26 = arith.addf %20, %25 : vector<224x128xf32>
    %c0_24 = arith.constant 0 : index
    %c17 = arith.constant 17 : index
    %c0_25 = arith.constant 0 : index
    %27 = vector.load %arg1[%c0_24, %c17, %c0_25] : memref<1x264x4xbf16, #tpu.memory_space<vmem>>, vector<1x224x4xbf16>
    %28 = vector.shape_cast %27 : vector<1x224x4xbf16> to vector<224x4xbf16>
    %c4 = arith.constant 4 : index
    %c0_26 = arith.constant 0 : index
    %c0_27 = arith.constant 0 : index
    %29 = vector.load %arg2[%c4, %c0_26, %c0_27] : memref<9x4x128xbf16, #tpu.memory_space<vmem>>, vector<1x4x128xbf16>
    %30 = vector.shape_cast %29 : vector<1x4x128xbf16> to vector<4x128xbf16>
    %cst_28 = arith.constant dense<0.000000e+00> : vector<224x128xf32>
    %31 = tpu.matmul %28, %30, %cst_28 {dimension_numbers = #tpu.dot_dimension_numbers<[1], [0], [0], [1], [0, 0, 1, 1], [], []>} : vector<224x4xbf16>, vector<4x128xbf16>, vector<224x128xf32> -> vector<224x128xf32>
    %32 = arith.addf %26, %31 : vector<224x128xf32>
    %c0_29 = arith.constant 0 : index
    %c18 = arith.constant 18 : index
    %c0_30 = arith.constant 0 : index
    %33 = vector.load %arg1[%c0_29, %c18, %c0_30] : memref<1x264x4xbf16, #tpu.memory_space<vmem>>, vector<1x224x4xbf16>
    %34 = vector.shape_cast %33 : vector<1x224x4xbf16> to vector<224x4xbf16>
    %c5 = arith.constant 5 : index
    %c0_31 = arith.constant 0 : index
    %c0_32 = arith.constant 0 : index
    %35 = vector.load %arg2[%c5, %c0_31, %c0_32] : memref<9x4x128xbf16, #tpu.memory_space<vmem>>, vector<1x4x128xbf16>
    %36 = vector.shape_cast %35 : vector<1x4x128xbf16> to vector<4x128xbf16>
    %cst_33 = arith.constant dense<0.000000e+00> : vector<224x128xf32>
    %37 = tpu.matmul %34, %36, %cst_33 {dimension_numbers = #tpu.dot_dimension_numbers<[1], [0], [0], [1], [0, 0, 1, 1], [], []>} : vector<224x4xbf16>, vector<4x128xbf16>, vector<224x128xf32> -> vector<224x128xf32>
    %38 = arith.addf %32, %37 : vector<224x128xf32>
    %c0_34 = arith.constant 0 : index
    %c32 = arith.constant 32 : index
    %c0_35 = arith.constant 0 : index
    %39 = vector.load %arg1[%c0_34, %c32, %c0_35] : memref<1x264x4xbf16, #tpu.memory_space<vmem>>, vector<1x224x4xbf16>
    %40 = vector.shape_cast %39 : vector<1x224x4xbf16> to vector<224x4xbf16>
    %c6 = arith.constant 6 : index
    %c0_36 = arith.constant 0 : index
    %c0_37 = arith.constant 0 : index
    %41 = vector.load %arg2[%c6, %c0_36, %c0_37] : memref<9x4x128xbf16, #tpu.memory_space<vmem>>, vector<1x4x128xbf16>
    %42 = vector.shape_cast %41 : vector<1x4x128xbf16> to vector<4x128xbf16>
    %cst_38 = arith.constant dense<0.000000e+00> : vector<224x128xf32>
    %43 = tpu.matmul %40, %42, %cst_38 {dimension_numbers = #tpu.dot_dimension_numbers<[1], [0], [0], [1], [0, 0, 1, 1], [], []>} : vector<224x4xbf16>, vector<4x128xbf16>, vector<224x128xf32> -> vector<224x128xf32>
    %44 = arith.addf %38, %43 : vector<224x128xf32>
    %c0_39 = arith.constant 0 : index
    %c33 = arith.constant 33 : index
    %c0_40 = arith.constant 0 : index
    %45 = vector.load %arg1[%c0_39, %c33, %c0_40] : memref<1x264x4xbf16, #tpu.memory_space<vmem>>, vector<1x224x4xbf16>
    %46 = vector.shape_cast %45 : vector<1x224x4xbf16> to vector<224x4xbf16>
    %c7 = arith.constant 7 : index
    %c0_41 = arith.constant 0 : index
    %c0_42 = arith.constant 0 : index
    %47 = vector.load %arg2[%c7, %c0_41, %c0_42] : memref<9x4x128xbf16, #tpu.memory_space<vmem>>, vector<1x4x128xbf16>
    %48 = vector.shape_cast %47 : vector<1x4x128xbf16> to vector<4x128xbf16>
    %cst_43 = arith.constant dense<0.000000e+00> : vector<224x128xf32>
    %49 = tpu.matmul %46, %48, %cst_43 {dimension_numbers = #tpu.dot_dimension_numbers<[1], [0], [0], [1], [0, 0, 1, 1], [], []>} : vector<224x4xbf16>, vector<4x128xbf16>, vector<224x128xf32> -> vector<224x128xf32>
    %50 = arith.addf %44, %49 : vector<224x128xf32>
    %c0_44 = arith.constant 0 : index
    %c34 = arith.constant 34 : index
    %c0_45 = arith.constant 0 : index
    %51 = vector.load %arg1[%c0_44, %c34, %c0_45] : memref<1x264x4xbf16, #tpu.memory_space<vmem>>, vector<1x224x4xbf16>
    %52 = vector.shape_cast %51 : vector<1x224x4xbf16> to vector<224x4xbf16>
    %c8 = arith.constant 8 : index
    %c0_46 = arith.constant 0 : index
    %c0_47 = arith.constant 0 : index
    %53 = vector.load %arg2[%c8, %c0_46, %c0_47] : memref<9x4x128xbf16, #tpu.memory_space<vmem>>, vector<1x4x128xbf16>
    %54 = vector.shape_cast %53 : vector<1x4x128xbf16> to vector<4x128xbf16>
    %cst_48 = arith.constant dense<0.000000e+00> : vector<224x128xf32>
    %55 = tpu.matmul %52, %54, %cst_48 {dimension_numbers = #tpu.dot_dimension_numbers<[1], [0], [0], [1], [0, 0, 1, 1], [], []>} : vector<224x4xbf16>, vector<4x128xbf16>, vector<224x128xf32> -> vector<224x128xf32>
    %56 = arith.addf %50, %55 : vector<224x128xf32>
    %c0_49 = arith.constant 0 : index
    %c0_50 = arith.constant 0 : index
    %c0_51 = arith.constant 0 : index
    %57 = vector.load %arg4[%c0_49, %c0_50, %c0_51] : memref<1x224x128xf32, #tpu.memory_space<vmem>>, vector<1x224x128xf32>
    %58 = vector.shape_cast %57 : vector<1x224x128xf32> to vector<224x128xf32>
    %59 = vector.shape_cast %56 : vector<224x128xf32> to vector<1x224x128xf32>
    tpu.vector_store %arg4[%c0_49, %c0_50, %c0_51], %59 {strides = array<i32>} : memref<1x224x128xf32, #tpu.memory_space<vmem>>, vector<1x224x128xf32>,
    return
  }
  func.func @transform_0(%arg0: i32) -> (i32, i32, i32) {
    %c0_i32 = arith.constant 0 : i32
    %c0_i32_0 = arith.constant 0 : i32
    %c0_i32_1 = arith.constant 0 : i32
    return %arg0, %c0_i32, %c0_i32_0 : i32, i32, i32
  }
  func.func @transform_1(%arg0: i32) -> (i32, i32, i32) {
    %c0_i32 = arith.constant 0 : i32
    %c0_i32_0 = arith.constant 0 : i32
    %c0_i32_1 = arith.constant 0 : i32
    %c0_i32_2 = arith.constant 0 : i32
    return %c0_i32, %c0_i32_0, %c0_i32_1 : i32, i32, i32
  }
  func.func @transform_2(%arg0: i32) -> (i32, i32) {
    %c0_i32 = arith.constant 0 : i32
    %c0_i32_0 = arith.constant 0 : i32
    %c0_i32_1 = arith.constant 0 : i32
    return %c0_i32, %c0_i32_0 : i32, i32
  }
  func.func @transform_3(%arg0: i32) -> (i32, i32, i32) {
    %c0_i32 = arith.constant 0 : i32
    %c0_i32_0 = arith.constant 0 : i32
    %c0_i32_1 = arith.constant 0 : i32
    return %arg0, %c0_i32, %c0_i32_0 : i32, i32, i32
  }
}

</mosaic_0001>

<bundles_post_ra>
// kernel: resnet9_cutlass_forward.1
= control target key start
LH: loop header
LB: loop body
LE: loop exit
PB: predicated region body
PF: predicated region fallthrough
CT: control target
= control target key end

     0   :  { %s3308_s12 = smov 0   ;;  %s4167_s0 = inlined_call_operand.vmem [shape: bf16[2,264,4], index: 0, kind: input, shape index: {}]   ;;  %s4168_s1 = inlined_call_operand.vmem [shape: bf16[9,4,128], index: 1, kind: input, shape index: {}]   ;;  %s4169_s2 = inlined_call_operand.vmem [shape: f32[1,128], index: 2, kind: input, shape index: {}]   ;;  %s4170_s3 = inlined_call_operand.vmem [shape: f32[2,224,128], index: 3, kind: output, shape index: {}]  }
   0x1 LB: > { %s2695_s13 = sadd.s32 4294967295, %s3286_s12   ;;  %p2699_p0 = scmp.ge.s32.totalorder %s3286_s12, 1  ;;  %s3286_s12 = sphi %s3308_s12, %s13_s12  }
   0x2   : > { %p137_p1 = scmp.lt.s32.totalorder %s3286_s12, 3 }
   0x4   : > { %p138_p2 = pnand %p2699_p0, %p137_p1 }
   0x6   : > { %141 = sbr.rel (%p138_p2) target bundleno = 662 (0x296), region = 32 }
   0xb   : > { %v204_v0 = vld [vmem:[%s4168_s1] sm:$0x3]  ;;  %vm318_vm0 = vcmask 1041408   ;;  %p161_p3 = scmp.lt.s32.totalorder %s2695_s13, 1  ;;  %v2839_v2 = vld [vmem:[%s4168_s1 + $0x4] sm:$0x3] }
   0xc   : > { %v320_v1 = vsel %vm318_vm0, %v204_v0, 0  ;;  %v2772_v3 = vld [vmem:[%s4168_s1 + $0x2] sm:$0x3]  ;;  %v881_v4 = vsel %vm318_vm0, %v2839_v2, 0  ;;  %v2925_v6 = vld [vmem:[%s4168_s1 + $0x8] sm:$0x3] }
   0xd   : > { %3266 = vmatpush.bf16.msra.mxu1 %v320_v1  ;;  %3267 = vmatpush.bf16.msra.mxu2 %v320_v1  ;;  %s4198_s13 = smov (!%p161_p3, %s2695_s13), 1  ;;  %v693_v5 = vsel %vm318_vm0, %v2772_v3, 0  ;;  %v1505_v7 = vsel %vm318_vm0, %v2925_v6, 0  ;;  %vm275_vm1 = vcmask 31744   ;;  %v2854_v12 = vld [vmem:[%s4168_s1 + $0x6] sm:$0x3] }
   0xe   : > { %329 = vmatpush.bf16.msra.mxu0 %v320_v1  ;;  %s3269_s22 = smul.u32 132, %s4198_s13  ;;  %3268 = vmatpush.bf16.msra.mxu3 %v320_v1  ;;  %v1133_v13 = vsel %vm318_vm0, %v2854_v12, 0  ;;  %v3007_v22 = vld [vmem:[%s4168_s1 + $0xc] sm:$0x3]  ;;  %v3078_v24 = vld [vmem:[%s4168_s1 + $0xe] sm:$0x3] }
   0xf   : > { %v1944_v23 = vsel %vm318_vm0, %v3007_v22, 0  ;;  %v2992_v25 = vld [vmem:[%s4168_s1 + $0xa] sm:$0x3]  ;;  %v2316_v26 = vsel %vm318_vm0, %v3078_v24, 0  ;;  %v3145_v28 = vld [vmem:[%s4168_s1 + $0x10] sm:$0x3] }
  0x10   : > { %s3338_s25 = scalar_lea.vmem %s4167_s0, %s3269_s22  ;;  %v1692_v27 = vsel %vm318_vm0, %v2992_v25, 0  ;;  %v2503_v29 = vsel %vm318_vm0, %v3145_v28, 0  ;;  %vm533_vm2 = vsmask.f32 7424  ;;  %vm808_vm3 = vcmask 1046528   ;;  %s3270_s11 = smul.u32 224, %s4198_s13 }
  0x11   : > { %890 = vmatpush.bf16.msrb.mxu2 %v881_v4  ;;  %702 = vmatpush.bf16.msrb.mxu1 %v693_v5  ;;  %v3166_v8 = vld [vmem:[%s3338_s25 + $0x20] sm:$0xff]  ;;  %v3167_v14 = vld [vmem:[%s3338_s25 + $0x28] sm:$0xff]  ;;  %v3168_v18 = vld [vmem:[%s3338_s25 + $0x30] sm:$0xff] }
  0x12   : > { %1514 = vmatpush.bf16.msrb.mxu0 %v1505_v7  ;;  %v3170_v9 = vld [vmem:[%s3338_s25 + $0x40] sm:$0xff]  ;;  %2762 = vmatmul.msk.bf16.vlgmr.msra.gmra.mxu1 %vm275_vm1, %v3166_v8  ;;  %v3171_v15 = vld [vmem:[%s3338_s25 + $0x48] sm:$0xff]  ;;  %v3172_v19 = vld [vmem:[%s3338_s25 + $0x50] sm:$0xff]  ;;  %s4036_s16 = scalar_lea.vmem %s4170_s3, %s3270_s11 }
  0x13   : > { %v3162_v10 = vld [vmem:[%s3338_s25] sm:$0xff]  ;;  %2766 = vmatmul.msk.bf16.vlgmr.msra.gmra.mxu2 %vm275_vm1, %v3170_v9  ;;  %1142 = vmatpush.bf16.msrb.mxu3 %v1133_v13  ;;  %v3163_v16 = vld [vmem:[%s3338_s25 + $0x8] sm:$0xff]  ;;  %v3164_v20 = vld [vmem:[%s3338_s25 + $0x10] sm:$0xff] }
  0x14   : > { %v3174_v11 = vld [vmem:[%s3338_s25 + $0x60] sm:$0xff]  ;;  %2758 = vmatmul.msk.bf16.vlgmr.msra.gmra.mxu0 %vm275_vm1, %v3162_v10  ;;  %v3175_v17 = vld [vmem:[%s3338_s25 + $0x68] sm:$0xff]  ;;  %v3169_v30 = vld [vmem:[%s3338_s25 + $0x38] sm:$0xff] }
  0x15   : > { %2770 = vmatmul.msk.bf16.vlgmr.msra.gmra.mxu3 %vm275_vm1, %v3174_v11  ;;  %v3189_v21 = vld [vmem:[%s3338_s25 + $0x8] sm:$0xff]  ;;  %1953 = vmatpush.bf16.msra.mxu2 %v1944_v23  ;;  %v3173_v31 = vld [vmem:[%s3338_s25 + $0x58] sm:$0xff]  ;;  %v3244_v33 = vld [vmem:[%s3338_s25] sm:$0xff]  }
  0x16   : > { %1701 = vmatpush.bf16.msra.mxu1 %v1692_v27  ;;  %2512 = vmatpush.bf16.msra.mxu0 %v2503_v29  ;;  %v3165_v32 = vld [vmem:[%s3338_s25 + $0x18] sm:$0xff]  ;;  %v3190_v34 = vld [vmem:[%s3338_s25 + $0x10] sm:$0xff]  ;;  %v3258_v35 = vld [vmem:[%s3338_s25 + $0x8] sm:$0xff]   ;;  %v537_v37 = vshll.u32 %v3244_v33, 16  ;;  %v535_v42 = vshrl.u32 %v3244_v33, 16 }
  0x17   : > { %2325 = vmatpush.bf16.msra.mxu3 %v2316_v26  ;;  %v3176_v36 = vld [vmem:[%s3338_s25 + $0x8] sm:$0xff]  ;;  %v3255_v38 = vld [vmem:[%s3338_s25] sm:$0xf0]  ;;  %v3256_v39 = vld [vmem:[%s3338_s25] sm:$0xe]  ;;  %v1349_v41 = vshll.u32 %v3258_v35, 16 }
  0x18   : > { %v3397_v40 = vld [vmem:[%s3338_s25 + $0x10] sm:$0xff]  ;;  %v539_v43 = vrot.slane %v537_v37, 1  ;;  %v542_v44 = vshll.u32 %v3176_v36, 16  ;;  %v3257_v45 = vor.u32 %v3256_v39, %v3255_v38  ;;  %v1347_v46 = vshrl.u32 %v3258_v35, 16  ;;  %v3191_v58 = vld [vmem:[%s3338_s25 + $0x18] sm:$0xff]  ;;  %v3192_v9 = vld [vmem:[%s3338_s25 + $0x20] sm:$0xff] }
  0x19   : > { %v1351_v47 = vrot.slane %v1349_v41, 1  ;;  %v1354_v48 = vshll.u32 %v3397_v40, 16  ;;  %v810_v52 = vrot.slane %v3176_v36, 1  ;;  %v3177_v59 = vld [vmem:[%s3338_s25 + $0x10] sm:$0xff]  ;;  %v3410_v60 = vld [vmem:[%s3338_s25 + $0x18] sm:$0xff]  ;;  %v546_v61 = vshrl.u32 %v3176_v36, 16 }
  0x1a   : > { %v540_v49 = vor.u32 %v539_v43, %v535_v42  ;;  %v544_v50 = vrot.slane %v542_v44, 1  ;;  %v809_v51 = vrot.slane %v3257_v45, 1  ;;  %v550_v62 = vshll.u32 %v3177_v59, 16  ;;  %v3178_v10 = vld [vmem:[%s3338_s25 + $0x18] sm:$0xff]  ;;  %v3424_v11 = vld [vmem:[%s3338_s25 + $0x20] sm:$0xff]  ;;  %v3193_v24 = vld [vmem:[%s3338_s25 + $0x28] sm:$0xff] }
  0x1b   : > { %v1352_v53 = vor.u32 %v1351_v47, %v1347_v46  ;;  %v1356_v54 = vrot.slane %v1354_v48, 1  ;;  %v1358_v63 = vshrl.u32 %v3397_v40, 16  ;;  %v1362_v0 = vshll.u32 %v3410_v60, 16  ;;  %v3179_v25 = vld [vmem:[%s3338_s25 + $0x20] sm:$0xff]  ;;  %v3438_v26 = vld [vmem:[%s3338_s25 + $0x28] sm:$0xff]  ;;  %v3194_v39 = vld [vmem:[%s3338_s25 + $0x30] sm:$0xff] }
  0x1c   : > { %v545_v55 = vsel %vm533_vm2, %v540_v49, %v544_v50  ;;  %v811_v56 = vsel %vm808_vm3, %v809_v51, %v810_v52  ;;  %v548_v1 = vor.u32 %v546_v61, %v544_v50  ;;  %v552_v2 = vrot.slane %v550_v62, 1  ;;  %v3180_v41 = vld [vmem:[%s3338_s25 + $0x28] sm:$0xff]  ;;  %v3452_v42 = vld [vmem:[%s3338_s25 + $0x30] sm:$0xff]  ;;  %v3460_v50 = vld [vmem:[%s4169_s2] ss:$0 sm:$0xff] }
  0x1d   : > { %v1357_v57 = vsel %vm533_vm2, %v1352_v53, %v1356_v54  ;;  %v812_v3 = vrot.slane %v3177_v59, 1  ;;  %v1360_v4 = vor.u32 %v1358_v63, %v1356_v54  ;;  %v1364_v5 = vrot.slane %v1362_v0, 1  ;;  %v3181_v61 = vld [vmem:[%s3338_s25 + $0x30] sm:$0xff]  ;;  %v3476_v62 = vld [vmem:[%s3338_s25 + $0x38] sm:$0xff] }
  0x1e   : > { %v553_v6 = vsel %vm533_vm2, %v548_v1, %v552_v2  ;;  %v554_v12 = vshrl.u32 %v3177_v59, 16  ;;  %v558_v13 = vshll.u32 %v3178_v10, 16  ;;  %v562_v27 = vshrl.u32 %v3178_v10, 16  ;;  %v3195_v59 = vld [vmem:[%s3338_s25 + $0x38] sm:$0xff] }
  0x1f   : > { %v813_v7 = vsel %vm808_vm3, %v810_v52, %v812_v3  ;;  %v1365_v8 = vsel %vm533_vm2, %v1360_v4, %v1364_v5  ;;  %v566_v28 = vshll.u32 %v3179_v25, 16  ;;  %v1374_v29 = vshrl.u32 %v3424_v11, 16 }
  0x20   : > { %v816_v33 = vrot.slane %v3179_v25, 1  ;;  %v570_v43 = vshrl.u32 %v3179_v25, 16  ;;  %v574_v44 = vshll.u32 %v3180_v41, 16  ;;  %v1382_v45 = vshrl.u32 %v3438_v26, 16 }
  0x21   : > { %v1386_v46 = vshll.u32 %v3452_v42, 16  ;;  %v818_v49 = vrot.slane %v3180_v41, 1 }
  0x22   : > { %2763 = vmatmul.msk.bf16.gmra.mxu1 %vm275_vm1, %v3167_v14  ;;  %v1366_v14 = vshrl.u32 %v3410_v60, 16  ;;  %v576_v48 = vrot.slane %v574_v44, 1 }
  0x23   : > { %2767 = vmatmul.msk.bf16.gmra.mxu2 %vm275_vm1, %v3171_v15  ;;  %v1370_v15 = vshll.u32 %v3424_v11, 16  ;;  %v1388_v52 = vrot.slane %v1386_v46, 1 }
  0x24   : > { %2759 = vmatmul.msk.bf16.gmra.mxu0 %vm275_vm1, %v3163_v16  ;;  %v556_v16 = vor.u32 %v554_v12, %v552_v2  ;;  %v578_v2 = vshrl.u32 %v3180_v41, 16 }
  0x25   : > { %2771 = vmatmul.msk.bf16.gmra.mxu3 %vm275_vm1, %v3175_v17  ;;  %v560_v17 = vrot.slane %v558_v13, 1  ;;  %v820_v13 = vrot.slane %v3181_v61, 1 }
  0x32   : > { %2764 = vmatmul.msk.bf16.gmra.mxu1 %vm275_vm1, %v3168_v18  ;;  %v814_v18 = vrot.slane %v3178_v10, 1  ;;  %v580_v10 = vor.u32 %v578_v2, %v576_v48  ;;  %v3548_v2 = vld [vmem:[%s3338_s25 + $0x48] sm:$0xff] }
  0x33   : > { %2768 = vmatmul.msk.bf16.gmra.mxu2 %vm275_vm1, %v3172_v19  ;;  %v1368_v19 = vor.u32 %v1366_v14, %v1364_v5 }
  0x34   : > { %2760 = vmatmul.msk.bf16.gmra.mxu0 %vm275_vm1, %v3164_v20  ;;  %v1372_v20 = vrot.slane %v1370_v15, 1  ;;  %v815_v22 = vsel %vm808_vm3, %v812_v3, %v814_v18  ;;  %v817_v37 = vsel %vm808_vm3, %v814_v18, %v816_v33  ;;  %v582_v3 = vshll.u32 %v3181_v61, 16 }
  0x35   : > { %2911 = vmatmul.msk.bf16.vlgmr.msrb.gmra.mxu3 %vm275_vm1, %v3189_v21  ;;  %v561_v21 = vsel %vm533_vm2, %v556_v16, %v560_v17 }
  0x36   : > { %v1373_v23 = vsel %vm533_vm2, %v1368_v19, %v1372_v20  ;;  %v584_v12 = vrot.slane %v582_v3, 1 }
  0x38   : > { %v585_v19 = vsel %vm533_vm2, %v580_v10, %v584_v12 }
  0x42   : > { %2765 = vmatmul.msk.bf16.gmra.mxu1 %vm275_vm1, %v3169_v30  ;;  %v1378_v30 = vshll.u32 %v3438_v26, 16 }
  0x43   : > { %2769 = vmatmul.msk.bf16.gmra.mxu2 %vm275_vm1, %v3173_v31  ;;  %v564_v31 = vor.u32 %v562_v27, %v560_v17  ;;  %v3196_v27 = vld [vmem:[%s3338_s25 + $0x40] sm:$0xff] }
  0x44   : > { %2761 = vmatmul.msk.bf16.gmra.mxu0 %vm275_vm1, %v3165_v32  ;;  %v568_v32 = vrot.slane %v566_v28, 1  ;;  %v1380_v35 = vrot.slane %v1378_v30, 1  ;;  %v3182_v28 = vld [vmem:[%s3338_s25 + $0x38] sm:$0xff] }
  0x45   : > { %2912 = vmatmul.msk.bf16.gmra.mxu3 %vm275_vm1, %v3190_v34  ;;  %v1376_v34 = vor.u32 %v1374_v29, %v1372_v20  ;;  %v821_v20 = vsel %vm808_vm3, %v818_v49, %v820_v13  ;;  %v3512_v29 = vld [vmem:[%s3338_s25 + $0x40] sm:$0xff] }
  0x46   : > { %v569_v36 = vsel %vm533_vm2, %v564_v31, %v568_v32  ;;  %v572_v47 = vor.u32 %v570_v43, %v568_v32  ;;  %v1384_v51 = vor.u32 %v1382_v45, %v1380_v35  ;;  %v822_v45 = vrot.slane %v3182_v28, 1 }
  0x47   : > { %v1381_v38 = vsel %vm533_vm2, %v1376_v34, %v1380_v35  ;;  %v590_v34 = vshll.u32 %v3182_v28, 16 }
  0x48   : > { %v577_v54 = vsel %vm533_vm2, %v572_v47, %v576_v48 }
  0x49   : > { %v592_v44 = vrot.slane %v590_v34, 1 }
  0x52   : > { %2825 = vmatmul.msk.bf16.vlgmr.msrb.gmra.mxu1 %vm275_vm1, %v545_v55  ;;  %v819_v55 = vsel %vm808_vm3, %v816_v33, %v818_v49  ;;  %v586_v33 = vshrl.u32 %v3181_v61, 16 }
  0x53   : > { %2840 = vmatmul.msk.bf16.vlgmr.msrb.gmra.mxu2 %vm275_vm1, %v811_v56 }
  0x54   : > { %2978 = vmatmul.msk.bf16.vlgmr.msrb.gmra.mxu0 %vm275_vm1, %v1357_v57  ;;  %v588_v43 = vor.u32 %v586_v33, %v584_v12 }
  0x55   : > { %2913 = vmatmul.msk.bf16.gmra.mxu3 %vm275_vm1, %v3191_v58  ;;  %v1389_v58 = vsel %vm533_vm2, %v1384_v51, %v1388_v52 }
  0x62   : > { %2826 = vmatmul.msk.bf16.gmra.mxu1 %vm275_vm1, %v553_v6 }
  0x63   : > { %2841 = vmatmul.msk.bf16.gmra.mxu2 %vm275_vm1, %v813_v7  ;;  %v1390_v7 = vshrl.u32 %v3452_v42, 16 }
  0x64   : > { %2979 = vmatmul.msk.bf16.gmra.mxu0 %vm275_vm1, %v1365_v8  ;;  %v1394_v8 = vshll.u32 %v3476_v62, 16 }
  0x65   : > { %2914 = vmatmul.msk.bf16.gmra.mxu3 %vm275_vm1, %v3192_v9  ;;  %v1392_v14 = vor.u32 %v1390_v7, %v1388_v52  ;;  %v593_v52 = vsel %vm533_vm2, %v588_v43, %v592_v44  ;;  %v3198_v43 = vld [vmem:[%s3338_s25 + $0x50] sm:$0xff] }
  0x66   : > { %v1396_v15 = vrot.slane %v1394_v8, 1  ;;  %v594_v8 = vshrl.u32 %v3182_v28, 16 }
  0x72   : > { %2827 = vmatmul.msk.bf16.gmra.mxu1 %vm275_vm1, %v561_v21 }
  0x73   : > { %2842 = vmatmul.msk.bf16.gmra.mxu2 %vm275_vm1, %v815_v22 }
  0x74   : > { %2980 = vmatmul.msk.bf16.gmra.mxu0 %vm275_vm1, %v1373_v23 }
  0x75   : > { %2915 = vmatmul.msk.bf16.gmra.mxu3 %vm275_vm1, %v3193_v24  ;;  %v1397_v24 = vsel %vm533_vm2, %v1392_v14, %v1396_v15 }
  0x82   : > { %2828 = vmatmul.msk.bf16.gmra.mxu1 %vm275_vm1, %v569_v36 }
  0x83   : > { %2843 = vmatmul.msk.bf16.gmra.mxu2 %vm275_vm1, %v817_v37 }
  0x84   : > { %2981 = vmatmul.msk.bf16.gmra.mxu0 %vm275_vm1, %v1381_v38  ;;  %v1398_v38 = vshrl.u32 %v3476_v62, 16 }
  0x85   : > { %2916 = vmatmul.msk.bf16.gmra.mxu3 %vm275_vm1, %v3194_v39  ;;  %v1402_v39 = vshll.u32 %v3512_v29, 16 }
  0x86   : > { %v1400_v46 = vor.u32 %v1398_v38, %v1396_v15  ;;  %v1406_v15 = vshrl.u32 %v3512_v29, 16 }
  0x87   : > { %v1404_v47 = vrot.slane %v1402_v39, 1 }
  0x8f   : > { %v351_v53 = vpop.f32.mrf.mxu1 }
  0x90   : > { %v3465_v56 = vadd.f32 %v3460_v50, %v351_v53  ;;  %v823_v53 = vsel %vm808_vm3, %v820_v13, %v822_v45 }
  0x91   : > { %v3467_v57 = vpop.f32.mrf.mxu0 }
  0x92   : > { %2829 = vmatmul.msk.bf16.gmra.mxu1 %vm275_vm1, %v577_v54 }
  0x93   : > { %2844 = vmatmul.msk.bf16.gmra.mxu2 %vm275_vm1, %v819_v55 }
  0x94   : > { %2982 = vmatmul.msk.bf16.gmra.mxu0 %vm275_vm1, %v1389_v58 }
  0x95   : > { %2917 = vmatmul.msk.bf16.gmra.mxu3 %vm275_vm1, %v3195_v59  ;;  %v1405_v59 = vsel %vm533_vm2, %v1400_v46, %v1404_v47  ;;  %v3582_v46 = vld [vmem:[%s3338_s25 + $0x50] sm:$0xff] }
  0x96   : > { %v371_v63 = vpop.f32.mrf.mxu2  ;;  %4176 = vst [vmem:[#allocation3_spill] sm:$0xff] %v3582_v46 }
  0x97   : > { %v3480_v0 = vadd.f32 %v3460_v50, %v371_v63  ;;  %v353_v1 = vpop.f32.mrf.mxu1  ;;  %v3197_v63 = vld [vmem:[%s3338_s25 + $0x48] sm:$0xff] }
  0x98   : > { %v391_v4 = vpop.f32.mrf.mxu3  ;;  %v3483_v5 = vadd.f32 %v3460_v50, %v353_v1  ;;  %v3183_v1 = vld [vmem:[%s3338_s25 + $0x40] sm:$0xff] }
  0x99   : > { %v3485_v6 = vpop.f32.mrf.mxu0  ;;  %v3490_v9 = vadd.f32 %v3460_v50, %v391_v4  ;;  %v598_v10 = vshll.u32 %v3183_v1, 16 }
  0x9e   : > { %v373_v16 = vpop.f32.mrf.mxu2 }
  0x9f   : > { %v3493_v17 = vadd.f32 %v3460_v50, %v373_v16  ;;  %v356_v18 = vpop.f32.mrf.mxu1  ;;  %v1410_v16 = vshll.u32 %v3548_v2, 16 }
  0xa0   : > { %v393_v21 = vpop.f32.mrf.mxu3  ;;  %v3498_v22 = vadd.f32 %v3460_v50, %v356_v18  ;;  %v596_v18 = vor.u32 %v594_v8, %v592_v44  ;;  %v3184_v44 = vld [vmem:[%s3338_s25 + $0x48] sm:$0xff] }
  0xa1   : > { %v3500_v23 = vpop.f32.mrf.mxu0  ;;  %v3504_v25 = vadd.f32 %v3460_v50, %v393_v21  ;;  %v1408_v21 = vor.u32 %v1406_v15, %v1404_v47 }
  0xa2   : > { %2830 = vmatmul.msk.bf16.gmra.mxu1 %vm275_vm1, %v585_v19  ;;  %v600_v19 = vrot.slane %v598_v10, 1  ;;  %v826_v10 = vrot.slane %v3184_v44, 1 }
  0xa3   : > { %2845 = vmatmul.msk.bf16.gmra.mxu2 %vm275_vm1, %v821_v20  ;;  %v824_v20 = vrot.slane %v3183_v1, 1 }
  0xa4   : > { %2983 = vmatmul.msk.bf16.gmra.mxu0 %vm275_vm1, %v1397_v24  ;;  %v1412_v24 = vrot.slane %v1410_v16, 1 }
  0xa5   : > { %2918 = vmatmul.msk.bf16.gmra.mxu3 %vm275_vm1, %v3196_v27  ;;  %v825_v33 = vsel %vm808_vm3, %v822_v45, %v824_v20 }
  0xa6   : > { %v376_v30 = vpop.f32.mrf.mxu2  ;;  %v1413_v39 = vsel %vm533_vm2, %v1408_v21, %v1412_v24 }
  0xa7   : > { %v3516_v31 = vadd.f32 %v3460_v50, %v376_v30  ;;  %v358_v32 = vpop.f32.mrf.mxu1 }
  0xa8   : > { %v396_v35 = vpop.f32.mrf.mxu3  ;;  %v3519_v36 = vadd.f32 %v3460_v50, %v358_v32  ;;  %v601_v32 = vsel %vm533_vm2, %v596_v18, %v600_v19  ;;  %v401_v18 = vadd.f32 %v3460_v50, %v3467_v57  ;;  %v3612_v57 = vld [vmem:[%s3338_s25 + $0x50] sm:$0xff] }
  0xa9   : > { %v3521_v37 = vpop.f32.mrf.mxu0  ;;  %v3526_v41 = vadd.f32 %v3460_v50, %v396_v35 }
  0xae   : > { %v378_v48 = vpop.f32.mrf.mxu2 }
  0xaf   : > { %v3529_v49 = vadd.f32 %v3460_v50, %v378_v48  ;;  %v361_v51 = vpop.f32.mrf.mxu1 }
  0xb0   : > { %v398_v54 = vpop.f32.mrf.mxu3  ;;  %v3534_v55 = vadd.f32 %v3460_v50, %v361_v51  ;;  %v602_v51 = vshrl.u32 %v3183_v1, 16 }
  0xb1   : > { %v3536_v58 = vpop.f32.mrf.mxu0  ;;  %v3540_v61 = vadd.f32 %v3460_v50, %v398_v54 }
  0xb2   : > { %2831 = vmatmul.msk.bf16.gmra.mxu1 %vm275_vm1, %v593_v52  ;;  %v606_v52 = vshll.u32 %v3184_v44, 16 }
  0xb3   : > { %4175 = vst [vmem:[#allocation2_spill] sm:$0xff] %v3540_v61  ;;  %2846 = vmatmul.msk.bf16.gmra.mxu2 %vm275_vm1, %v823_v53 }
  0xb4   : > { %2984 = vmatmul.msk.bf16.gmra.mxu0 %vm275_vm1, %v1405_v59  ;;  %v608_v8 = vrot.slane %v606_v52, 1 }
  0xb5   : > { %2919 = vmatmul.msk.bf16.gmra.mxu3 %vm275_vm1, %v3197_v63  ;;  %v1414_v63 = vshrl.u32 %v3548_v2, 16 }
  0xb6   : > { %v381_v3 = vpop.f32.mrf.mxu2 }
  0xb7   : > { %v3552_v4 = vadd.f32 %v3460_v50, %v381_v3  ;;  %v363_v7 = vpop.f32.mrf.mxu1  ;;  %v1418_v3 = vshll.u32 %v3582_v46, 16  ;;  %v1416_v15 = vor.u32 %v1414_v63, %v1412_v24  ;;  %v610_v63 = vshrl.u32 %v3184_v44, 16 }
  0xb8   : > { %v3554_v12 = vpop.f32.mrf.mxu3  ;;  %v3557_v13 = vadd.f32 %v3460_v50, %v363_v7  ;;  %v604_v7 = vor.u32 %v602_v51, %v600_v19 }
  0xb9   : > { %v3559_v14 = vpop.f32.mrf.mxu0  ;;  %v1420_v16 = vrot.slane %v1418_v3, 1  ;;  %v614_v3 = vshll.u32 %v3612_v57, 16 }
  0xbb   : > { %v1421_v24 = vsel %vm533_vm2, %v1416_v15, %v1420_v16 }
  0xbe   : > { %v383_v27 = vpop.f32.mrf.mxu2 }
  0xbf   : > { %v3564_v28 = vadd.f32 %v3460_v50, %v383_v27  ;;  %v366_v30 = vpop.f32.mrf.mxu1 }
  0xc0   : > { %v3568_v34 = vpop.f32.mrf.mxu3  ;;  %v3571_v35 = vadd.f32 %v3460_v50, %v366_v30  ;;  %v609_v30 = vsel %vm533_vm2, %v604_v7, %v608_v8 }
  0xc1   : > { %v3573_v38 = vpop.f32.mrf.mxu0 }
  0xc2   : > { %2832 = vmatmul.msk.bf16.gmra.mxu1 %vm275_vm1, %v601_v32  ;;  %v827_v32 = vsel %vm808_vm3, %v824_v20, %v826_v10 }
  0xc3   : > { %2847 = vmatmul.msk.bf16.gmra.mxu2 %vm275_vm1, %v825_v33 }
  0xc4   : > { %2985 = vmatmul.msk.bf16.gmra.mxu0 %vm275_vm1, %v1413_v39 }
  0xc5   : > { %2920 = vmatmul.msk.bf16.gmra.mxu3 %vm275_vm1, %v3198_v43  ;;  %v3199_v43 = vld [vmem:[%s3338_s25 + $0x58] sm:$0xff] }
  0xc6   : > { %v386_v45 = vpop.f32.mrf.mxu2 }
  0xc7   : > { %v3586_v47 = vadd.f32 %v3460_v50, %v386_v45  ;;  %v368_v48 = vpop.f32.mrf.mxu1  ;;  %v3615_v45 = vld [vmem:[%s3338_s25 + $0x58] sm:$0xff] }
  0xc8   : > { %v3588_v53 = vpop.f32.mrf.mxu3  ;;  %v3591_v54 = vadd.f32 %v3460_v50, %v368_v48  ;;  %4177 = vst [vmem:[#allocation4_spill] sm:$0xff] %v3615_v45  ;;  %v402_v48 = vadd.f32 %v3460_v50, %v3485_v6  ;;  %v616_v6 = vrot.slane %v614_v3, 1 }
  0xc9   : > { %v3593_v59 = vpop.f32.mrf.mxu0 }
  0xce   : > { %v388_v1 = vpop.f32.mrf.mxu2 }
  0xcf   : > { %v3600_v21 = vadd.f32 %v3460_v50, %v388_v1  ;;  %v704_v27 = vpop.f32.mrf.mxu1 }
  0xd0   : > { %v3604_v33 = vpop.f32.mrf.mxu3  ;;  %v774_v19 = vadd.f32 %v704_v27, %v401_v18  ;;  %v1422_v27 = vshrl.u32 %v3582_v46, 16 }
  0xd1   : > { %v1516_v39 = vpop.f32.mrf.mxu0 }
  0xd2   : > { %2833 = vmatmul.msk.bf16.gmra.mxu1 %vm275_vm1, %v609_v30  ;;  %v1426_v30 = vshll.u32 %v3615_v45, 16  ;;  %v1424_v44 = vor.u32 %v1422_v27, %v1420_v16  ;;  %v3200_v27 = vld [vmem:[%s3338_s25 + $0x60] sm:$0xff] }
  0xd3   : > { %2848 = vmatmul.msk.bf16.gmra.mxu2 %vm275_vm1, %v827_v32 }
  0xd4   : > { %2986 = vmatmul.msk.bf16.gmra.mxu0 %vm275_vm1, %v1421_v24  ;;  %v612_v24 = vor.u32 %v610_v63, %v608_v8 }
  0xd5   : > { %2921 = vmatmul.msk.bf16.gmra.mxu3 %vm275_vm1, %v3199_v43  ;;  %v1428_v43 = vrot.slane %v1426_v30, 1  ;;  %v404_v30 = vadd.f32 %v3460_v50, %v3521_v37 }
  0xd6   : > { %v892_v20 = vpop.f32.mrf.mxu2 }
  0xd7   : > { %v962_v51 = vadd.f32 %v892_v20, %v774_v19  ;;  %v706_v52 = vpop.f32.mrf.mxu1  ;;  %v828_v19 = vrot.slane %v3612_v57, 1  ;;  %v1429_v16 = vsel %vm533_vm2, %v1424_v44, %v1428_v43 }
  0xd8   : > { %v3621_v7 = vpop.f32.mrf.mxu3  ;;  %v775_v1 = vadd.f32 %v706_v52, %v402_v48  ;;  %v617_v52 = vsel %vm533_vm2, %v612_v24, %v616_v6 }
  0xd9   : > { %v1214_v15 = vadd.f32 %v3554_v12, %v962_v51  ;;  %v1518_v18 = vpop.f32.mrf.mxu0  ;;  %v403_v12 = vadd.f32 %v3460_v50, %v3500_v23 }
  0xdb   : > { %v3626_v32 = vadd.f32 %v1516_v39, %v1214_v15  ;;  %v829_v39 = vsel %vm808_vm3, %v826_v10, %v828_v19  ;;  %v3647_v10 = vld [vmem:[%s3338_s25 + $0x60] sm:$0xff] }
  0xdc   : > { %4180 = vst [vmem:[#allocation7_spill] sm:$0xff] %v3647_v10 }
  0xdd   : > { %4178 = vst [vmem:[#allocation5_spill] sm:$0xff] %v3626_v32 }
  0xde   : > { %v894_v20 = vpop.f32.mrf.mxu2 }
  0xdf   : > { %v963_v48 = vadd.f32 %v894_v20, %v775_v1  ;;  %v709_v51 = vpop.f32.mrf.mxu1  ;;  %v3644_v1 = vld [vmem:[%s3338_s25 + $0x58] sm:$0xff]  ;;  %v618_v20 = vshrl.u32 %v3612_v57, 16 }
  0xe0   : > { %v3633_v15 = vpop.f32.mrf.mxu3  ;;  %v776_v63 = vadd.f32 %v709_v51, %v403_v12  ;;  %v622_v12 = vshll.u32 %v3644_v1, 16 }
  0xe1   : > { %v1215_v8 = vadd.f32 %v3568_v34, %v963_v48  ;;  %v1521_v3 = vpop.f32.mrf.mxu0 }
  0xe2   : > { %2834 = vmatmul.msk.bf16.gmra.mxu1 %vm275_vm1, %v617_v52  ;;  %v624_v37 = vrot.slane %v622_v12, 1 }
  0xe3   : > { %2849 = vmatmul.msk.bf16.gmra.mxu2 %vm275_vm1, %v829_v39  ;;  %v3640_v23 = vadd.f32 %v1518_v18, %v1215_v8  ;;  %v1430_v39 = vshrl.u32 %v3615_v45, 16  ;;  %v1434_v8 = vshll.u32 %v3647_v10, 16 }
  0xe4   : > { %2987 = vmatmul.msk.bf16.gmra.mxu0 %vm275_vm1, %v1429_v16 }
  0xe5   : > { %4179 = vst [vmem:[#allocation6_spill] sm:$0xff] %v3640_v23  ;;  %2922 = vmatmul.msk.bf16.gmra.mxu3 %vm275_vm1, %v3200_v27  ;;  %v620_v27 = vor.u32 %v618_v20, %v616_v6  ;;  %v1432_v57 = vor.u32 %v1430_v39, %v1428_v43  ;;  %v3201_v39 = vld [vmem:[%s3338_s25 + $0x68] sm:$0xff] }
  0xe6   : > { %v897_v34 = vpop.f32.mrf.mxu2 }
  0xe7   : > { %v964_v24 = vadd.f32 %v897_v34, %v776_v63  ;;  %v711_v44 = vpop.f32.mrf.mxu1  ;;  %v830_v63 = vrot.slane %v3644_v1, 1  ;;  %v1436_v34 = vrot.slane %v1434_v8, 1 }
  0xe8   : > { %v3654_v18 = vpop.f32.mrf.mxu3  ;;  %v777_v51 = vadd.f32 %v711_v44, %v404_v30  ;;  %v625_v44 = vsel %vm533_vm2, %v620_v27, %v624_v37 }
  0xe9   : > { %v1216_v48 = vadd.f32 %v3588_v53, %v964_v24  ;;  %v1523_v52 = vpop.f32.mrf.mxu0  ;;  %v405_v53 = vadd.f32 %v3460_v50, %v3536_v58  ;;  %v1437_v43 = vsel %vm533_vm2, %v1432_v57, %v1436_v34  ;;  %v626_v57 = vshrl.u32 %v3644_v1, 16 }
  0xeb   : > { %v3659_v16 = vadd.f32 %v1521_v3, %v1216_v48  ;;  %v831_v3 = vsel %vm808_vm3, %v828_v19, %v830_v63  ;;  %v3680_v19 = vld [vmem:[%s3338_s25 + $0x68] sm:$0xff] }
  0xec   : > { %4183 = vst [vmem:[#allocation10_spill] sm:$0xff] %v3680_v19 }
  0xed   : > { %4181 = vst [vmem:[#allocation8_spill] sm:$0xff] %v3659_v16 }
  0xee   : > { %v899_v23 = vpop.f32.mrf.mxu2 }
  0xef   : > { %v965_v30 = vadd.f32 %v899_v23, %v777_v51  ;;  %v714_v24 = vpop.f32.mrf.mxu1  ;;  %v3677_v23 = vld [vmem:[%s3338_s25 + $0x60] sm:$0xff]  ;;  %v406_v51 = vadd.f32 %v3460_v50, %v3559_v14 }
  0xf0   : > { %v3666_v48 = vpop.f32.mrf.mxu3  ;;  %v778_v20 = vadd.f32 %v714_v24, %v405_v53  ;;  %v630_v53 = vshll.u32 %v3677_v23, 16 }
  0xf1   : > { %v1217_v6 = vadd.f32 %v3604_v33, %v965_v30  ;;  %v1526_v12 = vpop.f32.mrf.mxu0 }
  0xf2   : > { %2835 = vmatmul.msk.bf16.gmra.mxu1 %vm275_vm1, %v625_v44  ;;  %v632_v14 = vrot.slane %v630_v53, 1 }
  0xf3   : > { %2850 = vmatmul.msk.bf16.gmra.mxu2 %vm275_vm1, %v831_v3  ;;  %v3673_v58 = vadd.f32 %v1523_v52, %v1217_v6  ;;  %v1438_v3 = vshrl.u32 %v3647_v10, 16  ;;  %v1442_v6 = vshll.u32 %v3680_v19, 16 }
  0xf4   : > { %2988 = vmatmul.msk.bf16.gmra.mxu0 %vm275_vm1, %v1437_v43 }
  0xf5   : > { %4182 = vst [vmem:[#allocation9_spill] sm:$0xff] %v3673_v58  ;;  %2923 = vmatmul.msk.bf16.gmra.mxu3 %vm275_vm1, %v3201_v39  ;;  %v628_v39 = vor.u32 %v626_v57, %v624_v37  ;;  %v1440_v1 = vor.u32 %v1438_v3, %v1436_v34  ;;  %v3202_v3 = vld [vmem:[%s3338_s25 + $0x70] sm:$0xff] }
  0xf6   : > { %v902_v33 = vpop.f32.mrf.mxu2 }
  0xf7   : > { %v966_v8 = vadd.f32 %v902_v33, %v778_v20  ;;  %v716_v27 = vpop.f32.mrf.mxu1  ;;  %v832_v20 = vrot.slane %v3677_v23, 1  ;;  %v1444_v33 = vrot.slane %v1442_v6, 1  ;;  %v3718_v6 = vld [vmem:[%s3338_s25 + $0x18] sm:$0xff] }
  0xf8   : > { %v3687_v52 = vpop.f32.mrf.mxu3  ;;  %v779_v24 = vadd.f32 %v716_v27, %v406_v51  ;;  %v633_v27 = vsel %vm533_vm2, %v628_v39, %v632_v14 }
  0xf9   : > { %v1218_v30 = vadd.f32 %v3621_v7, %v966_v8  ;;  %v1528_v44 = vpop.f32.mrf.mxu0  ;;  %v407_v7 = vadd.f32 %v3460_v50, %v3573_v38 }
  0xfb   : > { %v3692_v43 = vadd.f32 %v1526_v12, %v1218_v30  ;;  %v833_v12 = vsel %vm808_vm3, %v830_v63, %v832_v20  ;;  %v1445_v30 = vsel %vm533_vm2, %v1440_v1, %v1444_v33  ;;  %v3713_v63 = vld [vmem:[%s3338_s25 + $0x70] sm:$0xff]  ;;  %v408_v1 = vadd.f32 %v3460_v50, %v3593_v59 }
  0xfc   : > { %v2165_v59 = vshll.u32 %v3718_v6, 16 }
  0xfd   : > { %4184 = vst [vmem:[#allocation11_spill] sm:$0xff] %v3692_v43 }
  0xfe   : > { %v904_v58 = vpop.f32.mrf.mxu2  ;;  %v2167_v32 = vrot.slane %v2165_v59, 1 }
  0xff   : > { %v967_v51 = vadd.f32 %v904_v58, %v779_v24  ;;  %v719_v8 = vpop.f32.mrf.mxu1  ;;  %v3710_v58 = vld [vmem:[%s3338_s25 + $0x68] sm:$0xff] }
 0x100   : > { %v3699_v37 = vpop.f32.mrf.mxu3  ;;  %v780_v34 = vadd.f32 %v719_v8, %v407_v7  ;;  %v638_v8 = vshll.u32 %v3710_v58, 16  ;;  %v834_v10 = vrot.slane %v3710_v58, 1 }
 0x101   : > { %v1219_v57 = vadd.f32 %v3633_v15, %v967_v51  ;;  %v1531_v53 = vpop.f32.mrf.mxu0  ;;  %v3262_v15 = vld [vmem:[%s3338_s25 + $0x10] sm:$0xff]  }
 0x102   : > { %2836 = vmatmul.msk.bf16.gmra.mxu1 %vm275_vm1, %v633_v27  ;;  %v2160_v39 = vshll.u32 %v3262_v15, 16  ;;  %v2158_v43 = vshrl.u32 %v3262_v15, 16 }
 0x103   : > { %2851 = vmatmul.msk.bf16.gmra.mxu2 %vm275_vm1, %v833_v12  ;;  %v3706_v38 = vadd.f32 %v1528_v44, %v1219_v57  ;;  %v634_v44 = vshrl.u32 %v3677_v23, 16 }
 0x104   : > { %2989 = vmatmul.msk.bf16.gmra.mxu0 %vm275_vm1, %v1445_v30  ;;  %v2162_v50 = vrot.slane %v2160_v39, 1  ;;  %v835_v39 = vsel %vm808_vm3, %v832_v20, %v834_v10 }
 0x105   : > { %4185 = vst [vmem:[#allocation12_spill] sm:$0xff] %v3706_v38  ;;  %2924 = vmatmul.msk.bf16.gmra.mxu3 %vm275_vm1, %v3202_v3  ;;  %v1446_v3 = vshrl.u32 %v3680_v19, 16  ;;  %v1450_v38 = vshll.u32 %v3713_v63, 16  ;;  %v636_v23 = vor.u32 %v634_v44, %v632_v14 }
 0x106   : > { %v907_v24 = vpop.f32.mrf.mxu2 }
 0x107   : > { %v968_v7 = vadd.f32 %v907_v24, %v780_v34  ;;  %v721_v51 = vpop.f32.mrf.mxu1  ;;  %v640_v24 = vrot.slane %v638_v8, 1  ;;  %v1448_v16 = vor.u32 %v1446_v3, %v1444_v33  ;;  %v1452_v45 = vrot.slane %v1450_v38, 1 }
 0x108   : > { %v3724_v27 = vpop.f32.mrf.mxu3  ;;  %v781_v57 = vadd.f32 %v721_v51, %v408_v1  ;;  %v1270_v1 = vld [vmem:[%s3338_s25 + $0x78] sm:$0x1]  ;;  %v2163_v51 = vor.u32 %v2162_v50, %v2158_v43 }
 0x109   : > { %v1220_v12 = vadd.f32 %v3654_v18, %v968_v7  ;;  %v1533_v30 = vpop.f32.mrf.mxu0  ;;  %v457_v18 = vld [vmem:[%s3338_s25 + $0x70] sm:$0x1]  ;;  %v641_v15 = vsel %vm533_vm2, %v636_v23, %v640_v24  ;;  %v1453_v44 = vsel %vm533_vm2, %v1448_v16, %v1452_v45  ;;  %v1330_v8 = vunpack.c.l.b16 %v1270_v1 }
 0x10a   : > { %v517_v61 = vunpack.c.l.b16 %v457_v18  ;;  %v2168_v43 = vsel %vm533_vm2, %v2163_v51, %v2167_v32 }
 0x10b   : > { %v3730_v34 = vadd.f32 %v1531_v53, %v1220_v12 }
 0x10c   : > { %v532_v20 = vpack.c.b16 %v517_v61, %v517_v61  ;;  %v1454_v61 = vshrl.u32 %v3713_v63, 16 }
 0x10e   : > { %v909_v7 = vpop.f32.mrf.mxu2  ;;  %v646_v3 = vshll.u32 %v532_v20, 16 }
 0x10f   : > { %v969_v19 = vadd.f32 %v909_v7, %v781_v57  ;;  %v724_v46 = vpop.f32.mrf.mxu1  ;;  %v3748_v57 = vpack.c.b16 %v1330_v8, %v1330_v8  ;;  %v2169_v7 = vshrl.u32 %v3718_v6, 16 }
 0x110   : > { %v3737_v53 = vpop.f32.mrf.mxu3  ;;  %v782_v33 = vadd.f32 %v724_v46, %v3465_v56  ;;  %v3752_v46 = vld [vmem:[%s3338_s25 + $0x20] sm:$0xff] }
 0x111   : > { %v1221_v14 = vadd.f32 %v3666_v48, %v969_v19  ;;  %v1536_v38 = vpop.f32.mrf.mxu0  ;;  %v642_v19 = vshrl.u32 %v3710_v58, 16  ;;  %v1458_v18 = vshll.u32 %v3748_v57, 16  ;;  %v2173_v1 = vshll.u32 %v3752_v46, 16 }
 0x112   : > { %2837 = vmatmul.msk.bf16.gmra.mxu1 %vm275_vm1, %v641_v15  ;;  %v648_v58 = vrot.slane %v646_v3, 1  ;;  %v3260_v3 = vld [vmem:[%s3338_s25 + $0x8] sm:$0xe] }
 0x113   : > { %2852 = vmatmul.msk.bf16.gmra.mxu2 %vm275_vm1, %v835_v39  ;;  %v3745_v12 = vadd.f32 %v1533_v30, %v1221_v14  ;;  %v644_v15 = vor.u32 %v642_v19, %v640_v24  ;;  %v836_v39 = vrot.slane %v532_v20, 1  ;;  %v1456_v14 = vor.u32 %v1454_v61, %v1452_v45 }
 0x114   : > { %2990 = vmatmul.msk.bf16.gmra.mxu0 %vm275_vm1, %v1453_v44 }
 0x115   : > { %3131 = vmatmul.msk.bf16.vlgmr.msra.gmra.mxu3 %vm275_vm1, %v2168_v43 }
 0x116   : > { %v912_v56 = vpop.f32.mrf.mxu2 }
 0x117   : > { %v970_v16 = vadd.f32 %v912_v56, %v782_v33  ;;  %v726_v48 = vpop.f32.mrf.mxu1  ;;  %v1460_v33 = vrot.slane %v1458_v18, 1  ;;  %v649_v56 = vsel %vm533_vm2, %v644_v15, %v648_v58 }
 0x118   : > { %v3755_v50 = vpop.f32.mrf.mxu3  ;;  %v783_v59 = vadd.f32 %v726_v48, %v3483_v5  ;;  %v2175_v5 = vrot.slane %v2173_v1, 1 }
 0x119   : > { %v1222_v30 = vadd.f32 %v3687_v52, %v970_v16  ;;  %v1538_v23 = vpop.f32.mrf.mxu0  ;;  %v2171_v52 = vor.u32 %v2169_v7, %v2167_v32  ;;  %v837_v16 = vsel %vm808_vm3, %v834_v10, %v836_v39  ;;  %v1461_v32 = vsel %vm533_vm2, %v1456_v14, %v1460_v33  ;;  %v3259_v10 = vld [vmem:[%s3338_s25 + $0x8] sm:$0xf0] }
 0x11a   : > { %v3261_v7 = vor.u32 %v3260_v3, %v3259_v10  ;;  %v2177_v14 = vshrl.u32 %v3752_v46, 16 }
 0x11b   : > { %v3763_v51 = vadd.f32 %v1536_v38, %v1222_v30  ;;  %v2176_v48 = vsel %vm533_vm2, %v2171_v52, %v2175_v5  ;;  %v3263_v30 = vld [vmem:[%s3338_s25 + $0x10] sm:$0xf0] }
 0x11c   : > { %v1620_v52 = vrot.slane %v3261_v7, 1 }
 0x11e   : > { %v914_v44 = vpop.f32.mrf.mxu2 }
 0x11f   : > { %v971_v8 = vadd.f32 %v914_v44, %v783_v59  ;;  %v729_v43 = vpop.f32.mrf.mxu1  ;;  %v3784_v59 = vld [vmem:[%s3338_s25 + $0x28] sm:$0xff] }
 0x120   : > { %v3767_v38 = vpop.f32.mrf.mxu3  ;;  %v784_v45 = vadd.f32 %v729_v43, %v3498_v22  ;;  %v3264_v22 = vld [vmem:[%s3338_s25 + $0x10] sm:$0xe]  ;;  %v2181_v33 = vshll.u32 %v3784_v59, 16 }
 0x121   : > { %v1223_v24 = vadd.f32 %v3699_v37, %v971_v8  ;;  %v1541_v20 = vpop.f32.mrf.mxu0  ;;  %v3265_v39 = vor.u32 %v3264_v22, %v3263_v30  ;;  %v1621_v8 = vrot.slane %v3397_v40, 1  ;;  %v3811_v22 = vld [vmem:[%s3338_s25 + $0x30] sm:$0xff] }
 0x122   : > { %2838 = vmatmul.msk.bf16.gmra.mxu1 %vm275_vm1, %v649_v56  ;;  %v2432_v56 = vrot.slane %v3718_v6, 1 }
 0x123   : > { %2853 = vmatmul.msk.bf16.gmra.mxu2 %vm275_vm1, %v837_v16  ;;  %v3775_v19 = vadd.f32 %v1538_v23, %v1223_v24  ;;  %v2431_v43 = vrot.slane %v3265_v39, 1  ;;  %v2179_v24 = vor.u32 %v2177_v14, %v2175_v5  ;;  %v1623_v14 = vrot.slane %v3410_v60, 1 }
 0x124   : > { %2991 = vmatmul.msk.bf16.gmra.mxu0 %vm275_vm1, %v1461_v32 }
 0x125   : > { %3132 = vmatmul.msk.bf16.gmra.mxu3 %vm275_vm1, %v2176_v48  ;;  %v1622_v48 = vsel %vm808_vm3, %v1620_v52, %v1621_v8  ;;  %v2433_v40 = vsel %vm808_vm3, %v2431_v43, %v2432_v56 }
 0x126   : > { %v917_v37 = vpop.f32.mrf.mxu2 }
 0x127   : > { %v972_v61 = vadd.f32 %v917_v37, %v784_v45  ;;  %v731_v18 = vpop.f32.mrf.mxu1  ;;  %v2183_v45 = vrot.slane %v2181_v33, 1  ;;  %v2434_v33 = vrot.slane %v3752_v46, 1 }
 0x128   : > { %v3786_v1 = vpop.f32.mrf.mxu3  ;;  %v785_v15 = vadd.f32 %v731_v18, %v3519_v36  ;;  %v3216_v36 = vld [vmem:[%s3338_s25 + $0x10] sm:$0xff] }
 0x129   : > { %v1224_v23 = vadd.f32 %v3724_v27, %v972_v61  ;;  %v1543_v58 = vpop.f32.mrf.mxu0  ;;  %v2184_v6 = vsel %vm533_vm2, %v2179_v24, %v2183_v45  ;;  %v2435_v60 = vsel %vm808_vm3, %v2432_v56, %v2434_v33 }
 0x12b   : > { %v3792_v44 = vadd.f32 %v1541_v20, %v1224_v23 }
 0x12e   : > { %v919_v16 = vpop.f32.mrf.mxu2 }
 0x12f   : > { %v973_v27 = vadd.f32 %v919_v16, %v785_v15  ;;  %v734_v32 = vpop.f32.mrf.mxu1  ;;  %v2185_v15 = vshrl.u32 %v3784_v59, 16 }
 0x130   : > { %v3798_v10 = vpop.f32.mrf.mxu3  ;;  %v786_v3 = vadd.f32 %v734_v32, %v3534_v55 }
 0x131   : > { %v1225_v20 = vadd.f32 %v3737_v53, %v973_v27  ;;  %v1546_v37 = vpop.f32.mrf.mxu0  ;;  %v2187_v43 = vor.u32 %v2185_v15, %v2183_v45  ;;  %v3217_v27 = vld [vmem:[%s3338_s25 + $0x18] sm:$0xff] }
 0x132   : > { %2993 = vmatmul.msk.bf16.vlgmr.msra.gmra.mxu1 %vm275_vm1, %v1622_v48 }
 0x133   : > { %3064 = vmatmul.msk.bf16.vlgmr.msra.gmra.mxu2 %vm275_vm1, %v3216_v36  ;;  %v3806_v5 = vadd.f32 %v1543_v58, %v1225_v20  ;;  %v2189_v58 = vshll.u32 %v3811_v22, 16 }
 0x134   : > { %3146 = vmatmul.msk.bf16.vlgmr.msra.gmra.mxu0 %vm275_vm1, %v2433_v40 }
 0x135   : > { %3133 = vmatmul.msk.bf16.gmra.mxu3 %vm275_vm1, %v2184_v6  ;;  %v2191_v16 = vrot.slane %v2189_v58, 1 }
 0x136   : > { %v922_v30 = vpop.f32.mrf.mxu2 }
 0x137   : > { %v974_v55 = vadd.f32 %v922_v30, %v786_v3  ;;  %v736_v53 = vpop.f32.mrf.mxu1  ;;  %v2192_v46 = vsel %vm533_vm2, %v2187_v43, %v2191_v16  ;;  %v3838_v3 = vld [vmem:[%s3338_s25 + $0x38] sm:$0xff]  ;;  %v2193_v30 = vshrl.u32 %v3811_v22, 16  ;;  %v3218_v43 = vld [vmem:[%s3338_s25 + $0x20] sm:$0xff] }
 0x138   : > { %v3813_v61 = vpop.f32.mrf.mxu3  ;;  %v787_v7 = vadd.f32 %v736_v53, %v3557_v13  ;;  %v1624_v13 = vsel %vm808_vm3, %v1621_v8, %v1623_v14 }
 0x139   : > { %v1226_v18 = vadd.f32 %v3755_v50, %v974_v55  ;;  %v1548_v23 = vpop.f32.mrf.mxu0  ;;  %v2197_v55 = vshll.u32 %v3838_v3, 16  ;;  %v2195_v15 = vor.u32 %v2193_v30, %v2191_v16 }
 0x13b   : > { %v3819_v39 = vadd.f32 %v1546_v37, %v1226_v18  ;;  %v1625_v18 = vrot.slane %v3424_v11, 1  ;;  %v2199_v58 = vrot.slane %v2197_v55, 1 }
 0x13e   : > { %v924_v52 = vpop.f32.mrf.mxu2 }
 0x13f   : > { %v975_v24 = vadd.f32 %v924_v52, %v787_v7  ;;  %v739_v50 = vpop.f32.mrf.mxu1  ;;  %v2436_v7 = vrot.slane %v3784_v59, 1  ;;  %v2200_v59 = vsel %vm533_vm2, %v2195_v15, %v2199_v58 }
 0x140   : > { %v3825_v36 = vpop.f32.mrf.mxu3  ;;  %v788_v48 = vadd.f32 %v739_v50, %v3571_v35 }
 0x141   : > { %v1227_v32 = vadd.f32 %v3767_v38, %v975_v24  ;;  %v1551_v20 = vpop.f32.mrf.mxu0  ;;  %v2437_v11 = vsel %vm808_vm3, %v2434_v33, %v2436_v7 }
 0x142   : > { %2994 = vmatmul.msk.bf16.gmra.mxu1 %vm275_vm1, %v1624_v13 }
 0x143   : > { %3065 = vmatmul.msk.bf16.gmra.mxu2 %vm275_vm1, %v3217_v27  ;;  %v3833_v45 = vadd.f32 %v1548_v23, %v1227_v32  ;;  %v3865_v32 = vld [vmem:[%s3338_s25 + $0x40] sm:$0xff] }
 0x144   : > { %3147 = vmatmul.msk.bf16.gmra.mxu0 %vm275_vm1, %v2435_v60 }
 0x145   : > { %3134 = vmatmul.msk.bf16.gmra.mxu3 %vm275_vm1, %v2192_v46  ;;  %v2201_v46 = vshrl.u32 %v3838_v3, 16 }
 0x146   : > { %v927_v8 = vpop.f32.mrf.mxu2 }
 0x147   : > { %v976_v35 = vadd.f32 %v927_v8, %v788_v48  ;;  %v741_v38 = vpop.f32.mrf.mxu1  ;;  %v2205_v8 = vshll.u32 %v3865_v32, 16 }
 0x148   : > { %v3840_v37 = vpop.f32.mrf.mxu3  ;;  %v789_v40 = vadd.f32 %v741_v38, %v3591_v54  ;;  %v1626_v54 = vsel %vm808_vm3, %v1623_v14, %v1625_v18  ;;  %v1627_v38 = vrot.slane %v3438_v26, 1 }
 0x149   : > { %v1228_v56 = vadd.f32 %v3786_v1, %v976_v35  ;;  %v1553_v6 = vpop.f32.mrf.mxu0  ;;  %v2207_v30 = vrot.slane %v2205_v8, 1  ;;  %v3220_v8 = vld [vmem:[%s3338_s25 + $0x30] sm:$0xff] }
 0x14b   : > { %v3846_v53 = vadd.f32 %v1551_v20, %v1228_v56  ;;  %v2438_v56 = vrot.slane %v3811_v22, 1 }
 0x14d   : > { %v2439_v26 = vsel %vm808_vm3, %v2436_v7, %v2438_v56 }
 0x14e   : > { %v929_v23 = vpop.f32.mrf.mxu2 }
 0x14f   : > { %v977_v52 = vadd.f32 %v929_v23, %v789_v40  ;;  %v744_v1 = vpop.f32.mrf.mxu1  ;;  %v3219_v23 = vld [vmem:[%s3338_s25 + $0x28] sm:$0xff] }
 0x150   : > { %v3852_v24 = vpop.f32.mrf.mxu3  ;;  %v790_v50 = vadd.f32 %v744_v1, %v3480_v0 }
 0x151   : > { %v1229_v27 = vadd.f32 %v3798_v10, %v977_v52  ;;  %v1556_v13 = vpop.f32.mrf.mxu0 }
 0x152   : > { %2995 = vmatmul.msk.bf16.gmra.mxu1 %vm275_vm1, %v1626_v54  ;;  %v3892_v54 = vld [vmem:[%s3338_s25 + $0x48] sm:$0xff] }
 0x153   : > { %3066 = vmatmul.msk.bf16.gmra.mxu2 %vm275_vm1, %v3218_v43  ;;  %v3860_v16 = vadd.f32 %v1553_v6, %v1229_v27  ;;  %v2203_v6 = vor.u32 %v2201_v46, %v2199_v58 }
 0x154   : > { %3148 = vmatmul.msk.bf16.gmra.mxu0 %vm275_vm1, %v2437_v11  ;;  %v2209_v11 = vshrl.u32 %v3865_v32, 16 }
 0x155   : > { %3135 = vmatmul.msk.bf16.gmra.mxu3 %vm275_vm1, %v2200_v59  ;;  %v2208_v22 = vsel %vm533_vm2, %v2203_v6, %v2207_v30  ;;  %v2213_v59 = vshll.u32 %v3892_v54, 16 }
 0x156   : > { %v932_v14 = vpop.f32.mrf.mxu2 }
 0x157   : > { %v978_v0 = vadd.f32 %v932_v14, %v790_v50  ;;  %v746_v10 = vpop.f32.mrf.mxu1 }
 0x158   : > { %v3867_v48 = vpop.f32.mrf.mxu3  ;;  %v791_v20 = vadd.f32 %v746_v10, %v3493_v17  ;;  %v1628_v17 = vsel %vm808_vm3, %v1625_v18, %v1627_v38  ;;  %v2440_v10 = vrot.slane %v3838_v3, 1 }
 0x159   : > { %v1230_v33 = vadd.f32 %v3813_v61, %v978_v0  ;;  %v1558_v60 = vpop.f32.mrf.mxu0  ;;  %v1629_v0 = vrot.slane %v3452_v42, 1 }
 0x15a   : > { %v2441_v42 = vsel %vm808_vm3, %v2438_v56, %v2440_v10 }
 0x15b   : > { %v3873_v35 = vadd.f32 %v1556_v13, %v1230_v33 }
 0x15e   : > { %v934_v40 = vpop.f32.mrf.mxu2 }
 0x15f   : > { %v979_v55 = vadd.f32 %v934_v40, %v791_v20  ;;  %v749_v61 = vpop.f32.mrf.mxu1  ;;  %v2211_v20 = vor.u32 %v2209_v11, %v2207_v30  ;;  %v3221_v11 = vld [vmem:[%s3338_s25 + $0x38] sm:$0xff] }
 0x160   : > { %v3879_v15 = vpop.f32.mrf.mxu3  ;;  %v792_v43 = vadd.f32 %v749_v61, %v3516_v31  ;;  %v3919_v61 = vld [vmem:[%s3338_s25 + $0x50] sm:$0xff] }
 0x161   : > { %v1231_v52 = vadd.f32 %v3825_v36, %v979_v55  ;;  %v1561_v1 = vpop.f32.mrf.mxu0 }
 0x162   : > { %2996 = vmatmul.msk.bf16.gmra.mxu1 %vm275_vm1, %v1628_v17 }
 0x163   : > { %3067 = vmatmul.msk.bf16.gmra.mxu2 %vm275_vm1, %v3219_v23  ;;  %v3887_v58 = vadd.f32 %v1558_v60, %v1231_v52  ;;  %v2215_v60 = vrot.slane %v2213_v59, 1 }
 0x164   : > { %3149 = vmatmul.msk.bf16.gmra.mxu0 %vm275_vm1, %v2439_v26  ;;  %v2221_v26 = vshll.u32 %v3919_v61, 16 }
 0x165   : > { %3136 = vmatmul.msk.bf16.gmra.mxu3 %vm275_vm1, %v2208_v22  ;;  %v2216_v3 = vsel %vm533_vm2, %v2211_v20, %v2215_v60 }
 0x166   : > { %v937_v18 = vpop.f32.mrf.mxu2 }
 0x167   : > { %v980_v31 = vadd.f32 %v937_v18, %v792_v43  ;;  %v751_v36 = vpop.f32.mrf.mxu1  ;;  %v1631_v18 = vrot.slane %v3476_v62, 1 }
 0x168   : > { %v3894_v27 = vpop.f32.mrf.mxu3  ;;  %v793_v50 = vadd.f32 %v751_v36, %v3529_v49  ;;  %v1630_v49 = vsel %vm808_vm3, %v1627_v38, %v1629_v0 }
 0x169   : > { %v1232_v7 = vadd.f32 %v3840_v37, %v980_v31  ;;  %v1563_v13 = vpop.f32.mrf.mxu0  ;;  %v2442_v31 = vrot.slane %v3865_v32, 1 }
 0x16b   : > { %v3900_v14 = vadd.f32 %v1561_v1, %v1232_v7  ;;  %v2217_v1 = vshrl.u32 %v3892_v54, 16  ;;  %v2443_v62 = vsel %vm808_vm3, %v2440_v10, %v2442_v31 }
 0x16d   : > { %v2219_v7 = vor.u32 %v2217_v1, %v2215_v60 }
 0x16e   : > { %v939_v33 = vpop.f32.mrf.mxu2 }
 0x16f   : > { %v981_v46 = vadd.f32 %v939_v33, %v793_v50  ;;  %v754_v37 = vpop.f32.mrf.mxu1  ;;  %v2223_v50 = vrot.slane %v2221_v26, 1 }
 0x170   : > { %v3906_v40 = vpop.f32.mrf.mxu3  ;;  %v794_v55 = vadd.f32 %v754_v37, %v3552_v4 }
 0x171   : > { %v1233_v6 = vadd.f32 %v3852_v24, %v981_v46  ;;  %v1566_v23 = vpop.f32.mrf.mxu0  ;;  %v2224_v32 = vsel %vm533_vm2, %v2219_v7, %v2223_v50 }
 0x172   : > { %2997 = vmatmul.msk.bf16.gmra.mxu1 %vm275_vm1, %v1630_v49 }
 0x173   : > { %3068 = vmatmul.msk.bf16.gmra.mxu2 %vm275_vm1, %v3220_v8  ;;  %v3914_v30 = vadd.f32 %v1563_v13, %v1233_v6  ;;  %v3946_v8 = vld [vmem:[%s3338_s25 + $0x58] sm:$0xff] }
 0x174   : > { %3150 = vmatmul.msk.bf16.gmra.mxu0 %vm275_vm1, %v2441_v42 }
 0x175   : > { %3137 = vmatmul.msk.bf16.gmra.mxu3 %vm275_vm1, %v2216_v3  ;;  %v1633_v3 = vrot.slane %v3512_v29, 1 }
 0x176   : > { %v942_v38 = vpop.f32.mrf.mxu2 }
 0x177   : > { %v982_v4 = vadd.f32 %v942_v38, %v794_v55  ;;  %v756_v24 = vpop.f32.mrf.mxu1  ;;  %v2225_v55 = vshrl.u32 %v3919_v61, 16  ;;  %v2444_v38 = vrot.slane %v3892_v54, 1 }
 0x178   : > { %v3921_v17 = vpop.f32.mrf.mxu3  ;;  %v795_v52 = vadd.f32 %v756_v24, %v3564_v28  ;;  %v1632_v28 = vsel %vm808_vm3, %v1629_v0, %v1631_v18 }
 0x179   : > { %v1234_v56 = vadd.f32 %v3867_v48, %v982_v4  ;;  %v1568_v43 = vpop.f32.mrf.mxu0  ;;  %v2227_v24 = vor.u32 %v2225_v55, %v2223_v50  ;;  %v2445_v29 = vsel %vm808_vm3, %v2442_v31, %v2444_v38 }
 0x17b   : > { %v3927_v22 = vadd.f32 %v1566_v23, %v1234_v56  ;;  %v2229_v23 = vshll.u32 %v3946_v8, 16 }
 0x17d   : > { %v2231_v56 = vrot.slane %v2229_v23, 1 }
 0x17e   : > { %v944_v36 = vpop.f32.mrf.mxu2 }
 0x17f   : > { %v983_v13 = vadd.f32 %v944_v36, %v795_v52  ;;  %v759_v48 = vpop.f32.mrf.mxu1  ;;  %v2232_v54 = vsel %vm533_vm2, %v2227_v24, %v2231_v56 }
 0x180   : > { %v3933_v59 = vpop.f32.mrf.mxu3  ;;  %v796_v20 = vadd.f32 %v759_v48, %v3586_v47 }
 0x181   : > { %v1235_v33 = vadd.f32 %v3879_v15, %v983_v13  ;;  %v1571_v46 = vpop.f32.mrf.mxu0  ;;  %v3973_v13 = vld [vmem:[%s3338_s25 + $0x60] sm:$0xff] }
 0x182   : > { %2998 = vmatmul.msk.bf16.gmra.mxu1 %vm275_vm1, %v1632_v28 }
 0x183   : > { %3069 = vmatmul.msk.bf16.gmra.mxu2 %vm275_vm1, %v3221_v11  ;;  %v3941_v60 = vadd.f32 %v1568_v43, %v1235_v33  ;;  %v3222_v43 = vld [vmem:[%s3338_s25 + $0x40] sm:$0xff]  ;;  %v2233_v33 = vshrl.u32 %v3946_v8, 16 }
 0x184   : > { %3151 = vmatmul.msk.bf16.gmra.mxu0 %vm275_vm1, %v2443_v62  ;;  %v1635_v62 = vrot.slane %v3548_v2, 1 }
 0x185   : > { %3138 = vmatmul.msk.bf16.gmra.mxu3 %vm275_vm1, %v2224_v32  ;;  %v2446_v32 = vrot.slane %v3919_v61, 1 }
 0x186   : > { %v947_v0 = vpop.f32.mrf.mxu2 }
 0x187   : > { %v984_v47 = vadd.f32 %v947_v0, %v796_v20  ;;  %v761_v15 = vpop.f32.mrf.mxu1  ;;  %v2237_v20 = vshll.u32 %v3973_v13, 16  ;;  %v2447_v2 = vsel %vm808_vm3, %v2444_v38, %v2446_v32 }
 0x188   : > { %v3948_v37 = vpop.f32.mrf.mxu3  ;;  %v797_v49 = vadd.f32 %v761_v15, %v3600_v21  ;;  %v1634_v21 = vsel %vm808_vm3, %v1631_v18, %v1633_v3 }
 0x189   : > { %v1236_v10 = vadd.f32 %v3894_v27, %v984_v47  ;;  %v1573_v6 = vpop.f32.mrf.mxu0  ;;  %v2235_v47 = vor.u32 %v2233_v33, %v2231_v56  ;;  %v2239_v15 = vrot.slane %v2237_v20, 1  ;;  %v4000_v56 = vld [vmem:[%s3338_s25 + $0x68] sm:$0xff] }
 0x18b   : > { %v3954_v42 = vadd.f32 %v1571_v46, %v1236_v10  ;;  %v2240_v61 = vsel %vm533_vm2, %v2235_v47, %v2239_v15 }
 0x18e   : > { %v949_v4 = vpop.f32.mrf.mxu2 }
 0x18f   : > { %v985_v52 = vadd.f32 %v949_v4, %v797_v49  ;;  %v764_v27 = vpop.f32.mrf.mxu1  ;;  %v3223_v49 = vld [vmem:[%s3338_s25 + $0x48] sm:$0xff] }
 0x190   : > { %v3960_v1 = vpop.f32.mrf.mxu3  ;;  %v798_v36 = vadd.f32 %v764_v27, %v3490_v9 }
 0x191   : > { %v1237_v26 = vadd.f32 %v3906_v40, %v985_v52  ;;  %v1576_v7 = vpop.f32.mrf.mxu0 }
 0x192   : > { %2999 = vmatmul.msk.bf16.gmra.mxu1 %vm275_vm1, %v1634_v21 }
 0x193   : > { %3070 = vmatmul.msk.bf16.gmra.mxu2 %vm275_vm1, %v3222_v43  ;;  %v3968_v50 = vadd.f32 %v1573_v6, %v1237_v26  ;;  %v4186_v43 = vld [vmem:[#allocation2_spill] sm:$0xff]  ;;  %v2241_v26 = vshrl.u32 %v3973_v13, 16 }
 0x194   : > { %3152 = vmatmul.msk.bf16.gmra.mxu0 %vm275_vm1, %v2445_v29  ;;  %v4187_v29 = vld [vmem:[#allocation3_spill] sm:$0xff] }
 0x195   : > { %3139 = vmatmul.msk.bf16.gmra.mxu3 %vm275_vm1, %v2232_v54  ;;  %v1637_v54 = vrot.slane %v4187_v29, 1  ;;  %v3225_v29 = vld [vmem:[%s3338_s25 + $0x58] sm:$0xff] }
 0x196   : > { %v952_v18 = vpop.f32.mrf.mxu2 }
 0x197   : > { %v986_v9 = vadd.f32 %v952_v18, %v798_v36  ;;  %v766_v40 = vpop.f32.mrf.mxu1  ;;  %v2245_v36 = vshll.u32 %v4000_v56, 16  ;;  %v2448_v18 = vrot.slane %v3946_v8, 1  ;;  %v1638_v33 = vsel %vm808_vm3, %v1635_v62, %v1637_v54 }
 0x198   : > { %v3975_v11 = vpop.f32.mrf.mxu3  ;;  %v799_v48 = vadd.f32 %v766_v40, %v3504_v25  ;;  %v1636_v25 = vsel %vm808_vm3, %v1633_v3, %v1635_v62  ;;  %v2243_v40 = vor.u32 %v2241_v26, %v2239_v15  ;;  %v4188_v15 = vld [vmem:[#allocation5_spill] sm:$0xff] }
 0x199   : > { %v1238_v31 = vadd.f32 %v3921_v17, %v986_v9  ;;  %v1578_v28 = vpop.f32.mrf.mxu0 }
 0x19b   : > { %v3981_v46 = vadd.f32 %v1576_v7, %v1238_v31  ;;  %v2247_v31 = vrot.slane %v2245_v36, 1 }
 0x19e   : > { %v954_v0 = vpop.f32.mrf.mxu2 }
 0x19f   : > { %v987_v10 = vadd.f32 %v954_v0, %v799_v48  ;;  %v769_v17 = vpop.f32.mrf.mxu1 }
 0x1a0   : > { %v3987_v6 = vpop.f32.mrf.mxu3  ;;  %v800_v23 = vadd.f32 %v769_v17, %v3526_v41 }
 0x1a1   : > { %v1239_v55 = vadd.f32 %v3933_v59, %v987_v10  ;;  %v1581_v4 = vpop.f32.mrf.mxu0  ;;  %v2449_v10 = vsel %vm808_vm3, %v2446_v32, %v2448_v18 }
 0x1a2   : > { %3000 = vmatmul.msk.bf16.gmra.mxu1 %vm275_vm1, %v1636_v25 }
 0x1a3   : > { %3071 = vmatmul.msk.bf16.gmra.mxu2 %vm275_vm1, %v3223_v49  ;;  %v3995_v24 = vadd.f32 %v1578_v28, %v1239_v55  ;;  %v3224_v28 = vld [vmem:[%s3338_s25 + $0x50] sm:$0xff]  ;;  %v2248_v49 = vsel %vm533_vm2, %v2243_v40, %v2247_v31 }
 0x1a4   : > { %3153 = vmatmul.msk.bf16.gmra.mxu0 %vm275_vm1, %v2447_v2  ;;  %v2249_v2 = vshrl.u32 %v4000_v56, 16 }
 0x1a5   : > { %3140 = vmatmul.msk.bf16.gmra.mxu3 %vm275_vm1, %v2240_v61 }
 0x1a6   : > { %v957_v3 = vpop.f32.mrf.mxu2 }
 0x1a7   : > { %v988_v41 = vadd.f32 %v957_v3, %v800_v23  ;;  %v771_v59 = vpop.f32.mrf.mxu1 }
 0x1a8   : > { %v4002_v52 = vpop.f32.mrf.mxu3  ;;  %v801_v27 = vadd.f32 %v771_v59, %v4186_v43 }
 0x1a9   : > { %v1240_v38 = vadd.f32 %v3948_v37, %v988_v41  ;;  %v1583_v21 = vpop.f32.mrf.mxu0  ;;  %v4189_v41 = vld [vmem:[#allocation4_spill] sm:$0xff] }
 0x1aa   : > { %v1639_v59 = vrot.slane %v4189_v41, 1 }
 0x1ab   : > { %v4008_v7 = vadd.f32 %v1581_v4, %v1240_v38  ;;  %v4190_v38 = vld [vmem:[#allocation6_spill] sm:$0xff] }
 0x1ac   : > { %v1640_v40 = vsel %vm808_vm3, %v1637_v54, %v1639_v59 }
 0x1ae   : > { %v959_v9 = vpop.f32.mrf.mxu2 }
 0x1af   : > { %v989_v48 = vadd.f32 %v959_v9, %v801_v27  ;;  %v1703_v37 = vpop.f32.mrf.mxu1  ;;  %v2450_v27 = vrot.slane %v3973_v13, 1 }
 0x1b0   : > { %v4014_v20 = vpop.f32.mrf.mxu3  ;;  %v1773_v17 = vadd.f32 %v1703_v37, %v4188_v15 }
 0x1b1   : > { %v1241_v0 = vadd.f32 %v3960_v1, %v989_v48  ;;  %v2514_v47 = vpop.f32.mrf.mxu0  ;;  %v4028_v1 = vld [vmem:[%s3338_s25 + $0x70] sm:$0xff] }
 0x1b2   : > { %3001 = vmatmul.msk.bf16.gmra.mxu1 %vm275_vm1, %v1638_v33  ;;  %v2253_v61 = vshll.u32 %v4028_v1, 16  ;;  %v2451_v33 = vsel %vm808_vm3, %v2448_v18, %v2450_v27 }
 0x1b3   : > { %3072 = vmatmul.msk.bf16.gmra.mxu2 %vm275_vm1, %v3224_v28  ;;  %v4021_v8 = vadd.f32 %v1583_v21, %v1241_v0  ;;  %v2251_v21 = vor.u32 %v2249_v2, %v2247_v31  ;;  %v4191_v31 = vld [vmem:[#allocation8_spill] sm:$0xff]  ;;  %v4193_v2 = vld [vmem:[#allocation9_spill] sm:$0xff] }
 0x1b4   : > { %3154 = vmatmul.msk.bf16.gmra.mxu0 %vm275_vm1, %v2449_v10  ;;  %v2255_v26 = vrot.slane %v2253_v61, 1 }
 0x1b5   : > { %3141 = vmatmul.msk.bf16.gmra.mxu3 %vm275_vm1, %v2248_v49 }
 0x1b6   : > { %v1955_v62 = vpop.f32.mrf.mxu2  ;;  %v2256_v0 = vsel %vm533_vm2, %v2251_v21, %v2255_v26 }
 0x1b7   : > { %v2025_v25 = vadd.f32 %v1955_v62, %v1773_v17  ;;  %v1705_v32 = vpop.f32.mrf.mxu1  ;;  %v2257_v62 = vshrl.u32 %v4028_v1, 16 }
 0x1b8   : > { %v4030_v55 = vpop.f32.mrf.mxu3  ;;  %v1774_v43 = vadd.f32 %v1705_v32, %v4190_v38 }
 0x1b9   : > { %v2397_v23 = vadd.f32 %v3975_v11, %v2025_v25  ;;  %v2516_v4 = vpop.f32.mrf.mxu0  ;;  %v2259_v38 = vor.u32 %v2257_v62, %v2255_v26  ;;  %v2081_v26 = vld [vmem:[%s3338_s25 + $0x80] sm:$0x1] }
 0x1ba   : > { %v4195_v62 = vld [vmem:[#allocation10_spill] sm:$0xff] }
 0x1bb   : > { %v2584_v3 = vadd.f32 %v2514_v47, %v2397_v23  ;;  %v4192_v23 = vld [vmem:[#allocation7_spill] sm:$0xff] }
 0x1bd   : > { %2612 = vst [vmem:[%s4036_s16] sm:$0xff] %v2584_v3  ;;  %v2452_v3 = vrot.slane %v4000_v56, 1 }
 0x1be   : > { %v1957_v11 = vpop.f32.mrf.mxu2 }
 0x1bf   : > { %v2026_v36 = vadd.f32 %v1957_v11, %v1774_v43  ;;  %v1708_v9 = vpop.f32.mrf.mxu1 }
 0x1c0   : > { %v4046_v48 = vpop.f32.mrf.mxu3  ;;  %v1775_v54 = vadd.f32 %v1708_v9, %v4191_v31 }
 0x1c1   : > { %v2398_v28 = vadd.f32 %v3987_v6, %v2026_v36  ;;  %v2519_v37 = vpop.f32.mrf.mxu0  ;;  %v4058_v6 = vld [vmem:[%s3338_s25 + $0x78] sm:$0xff] }
 0x1c2   : > { %3002 = vmatmul.msk.bf16.gmra.mxu1 %vm275_vm1, %v1640_v40  ;;  %v2261_v25 = vshll.u32 %v4058_v6, 16 }
 0x1c3   : > { %v2585_v13 = vadd.f32 %v2516_v4, %v2398_v28  ;;  %3073 = vmatmul.msk.bf16.gmra.mxu2 %vm275_vm1, %v3225_v29  ;;  %v1641_v4 = vrot.slane %v4192_v23, 1  ;;  %v2453_v28 = vsel %vm808_vm3, %v2450_v27, %v2452_v3 }
 0x1c4   : > { %3155 = vmatmul.msk.bf16.gmra.mxu0 %vm275_vm1, %v2451_v33  ;;  %v2263_v43 = vrot.slane %v2261_v25, 1  ;;  %v2141_v33 = vunpack.c.l.b16 %v2081_v26  ;;  %v1643_v25 = vrot.slane %v4195_v62, 1 }
 0x1c5   : > { %2613 = vst [vmem:[%s4036_s16 + $0x8] sm:$0xff] %v2585_v13  ;;  %3142 = vmatmul.msk.bf16.gmra.mxu3 %vm275_vm1, %v2256_v0  ;;  %v1642_v36 = vsel %vm808_vm3, %v1639_v59, %v1641_v4  ;;  %v4194_v59 = vld [vmem:[#allocation11_spill] sm:$0xff] }
 0x1c6   : > { %v1960_v47 = vpop.f32.mrf.mxu2  ;;  %v4083_v13 = vpack.c.b16 %v2141_v33, %v2141_v33 }
 0x1c7   : > { %v2027_v10 = vadd.f32 %v1960_v47, %v1775_v54  ;;  %v1710_v18 = vpop.f32.mrf.mxu1 }
 0x1c8   : > { %v4060_v49 = vpop.f32.mrf.mxu3  ;;  %v1776_v61 = vadd.f32 %v1710_v18, %v4193_v2  ;;  %v2265_v18 = vshrl.u32 %v4058_v6, 16  ;;  %v2454_v2 = vrot.slane %v4028_v1, 1 }
 0x1c9   : > { %v2399_v15 = vadd.f32 %v4002_v52, %v2027_v10  ;;  %v2521_v17 = vpop.f32.mrf.mxu0  ;;  %v3226_v52 = vld [vmem:[%s3338_s25 + $0x60] sm:$0xff] }
 0x1cb   : > { %v2586_v32 = vadd.f32 %v2519_v37, %v2399_v15  ;;  %v2264_v37 = vsel %vm533_vm2, %v2259_v38, %v2263_v43  ;;  %v2269_v15 = vshll.u32 %v4083_v13, 16 }
 0x1cd   : > { %2614 = vst [vmem:[%s4036_s16 + $0x10] sm:$0xff] %v2586_v32  ;;  %v4196_v32 = vld [vmem:[#allocation12_spill] sm:$0xff]  ;;  %v2271_v38 = vrot.slane %v2269_v15, 1 }
 0x1ce   : > { %v1962_v41 = vpop.f32.mrf.mxu2 }
 0x1cf   : > { %v2028_v11 = vadd.f32 %v1962_v41, %v1776_v61  ;;  %v1713_v21 = vpop.f32.mrf.mxu1  ;;  %v2267_v41 = vor.u32 %v2265_v18, %v2263_v43 }
 0x1d0   : > { %v4071_v29 = vpop.f32.mrf.mxu3  ;;  %v1777_v0 = vadd.f32 %v1713_v21, %v4194_v59  ;;  %v1644_v21 = vsel %vm808_vm3, %v1641_v4, %v1643_v25 }
 0x1d1   : > { %v2400_v9 = vadd.f32 %v4014_v20, %v2028_v11  ;;  %v2524_v40 = vpop.f32.mrf.mxu0 }
 0x1d2   : > { %3003 = vmatmul.msk.bf16.gmra.mxu1 %vm275_vm1, %v1642_v36 }
 0x1d3   : > { %v2587_v56 = vadd.f32 %v2521_v17, %v2400_v9  ;;  %3074 = vmatmul.msk.bf16.gmra.mxu2 %vm275_vm1, %v3226_v52  ;;  %v3227_v52 = vld [vmem:[%s3338_s25 + $0x68] sm:$0xff] }
 0x1d4   : > { %3156 = vmatmul.msk.bf16.gmra.mxu0 %vm275_vm1, %v2453_v28  ;;  %v2455_v28 = vsel %vm808_vm3, %v2452_v3, %v2454_v2 }
 0x1d5   : > { %2615 = vst [vmem:[%s4036_s16 + $0x18] sm:$0xff] %v2587_v56  ;;  %3143 = vmatmul.msk.bf16.gmra.mxu3 %vm275_vm1, %v2264_v37  ;;  %v2272_v37 = vsel %vm533_vm2, %v2267_v41, %v2271_v38 }
 0x1d6   : > { %v1965_v20 = vpop.f32.mrf.mxu2 }
 0x1d7   : > { %v2029_v27 = vadd.f32 %v1965_v20, %v1777_v0  ;;  %v1715_v31 = vpop.f32.mrf.mxu1  ;;  %v1645_v0 = vrot.slane %v3713_v63, 1 }
 0x1d8   : > { %v2347_v54 = vpop.f32.mrf.mxu3  ;;  %v1778_v23 = vadd.f32 %v1715_v31, %v4196_v32 }
 0x1d9   : > { %v2401_v47 = vadd.f32 %v4030_v55, %v2029_v27  ;;  %v2526_v10 = vpop.f32.mrf.mxu0  ;;  %v2456_v27 = vrot.slane %v4058_v6, 1  ;;  %v1646_v18 = vsel %vm808_vm3, %v1643_v25, %v1645_v0 }
 0x1db   : > { %v2588_v17 = vadd.f32 %v2524_v40, %v2401_v47  ;;  %v3228_v47 = vld [vmem:[%s3338_s25 + $0x70] sm:$0xff]  ;;  %v2457_v62 = vsel %vm808_vm3, %v2454_v2, %v2456_v27  ;;  %v1647_v2 = vrot.slane %v3748_v57, 1 }
 0x1dd   : > { %2616 = vst [vmem:[%s4036_s16 + $0x20] sm:$0xff] %v2588_v17 }
 0x1de   : > { %v1967_v61 = vpop.f32.mrf.mxu2 }
 0x1df   : > { %v2030_v11 = vadd.f32 %v1967_v61, %v1778_v23  ;;  %v1718_v55 = vpop.f32.mrf.mxu1 }
 0x1e0   : > { %v2349_v36 = vpop.f32.mrf.mxu3  ;;  %v1779_v1 = vadd.f32 %v1718_v55, %v3730_v34 }
 0x1e1   : > { %v2402_v9 = vadd.f32 %v4046_v48, %v2030_v11  ;;  %v2529_v40 = vpop.f32.mrf.mxu0  ;;  %v2458_v11 = vrot.slane %v4083_v13, 1 }
 0x1e2   : > { %3004 = vmatmul.msk.bf16.gmra.mxu1 %vm275_vm1, %v1644_v21  ;;  %v3229_v21 = vld [vmem:[%s3338_s25 + $0x78] sm:$0xff] }
 0x1e3   : > { %v2589_v56 = vadd.f32 %v2526_v10, %v2402_v9  ;;  %3075 = vmatmul.msk.bf16.gmra.mxu2 %vm275_vm1, %v3227_v52 }
 0x1e4   : > { %3157 = vmatmul.msk.bf16.gmra.mxu0 %vm275_vm1, %v2455_v28  ;;  %v2459_v28 = vsel %vm808_vm3, %v2456_v27, %v2458_v11 }
 0x1e5   : > { %2617 = vst [vmem:[%s4036_s16 + $0x28] sm:$0xff] %v2589_v56  ;;  %3144 = vmatmul.msk.bf16.gmra.mxu3 %vm275_vm1, %v2272_v37 }
 0x1e6   : > { %v1970_v48 = vpop.f32.mrf.mxu2 }
 0x1e7   : > { %v2031_v4 = vadd.f32 %v1970_v48, %v1779_v1  ;;  %v1720_v43 = vpop.f32.mrf.mxu1 }
 0x1e8   : > { %v2352_v3 = vpop.f32.mrf.mxu3  ;;  %v1780_v20 = vadd.f32 %v1720_v43, %v3745_v12 }
 0x1e9   : > { %v2403_v26 = vadd.f32 %v4060_v49, %v2031_v4  ;;  %v2531_v33 = vpop.f32.mrf.mxu0 }
 0x1eb   : > { %v2590_v59 = vadd.f32 %v2529_v40, %v2403_v26 }
 0x1ed   : > { %2618 = vst [vmem:[%s4036_s16 + $0x30] sm:$0xff] %v2590_v59 }
 0x1ee   : > { %v1972_v31 = vpop.f32.mrf.mxu2 }
 0x1ef   : > { %v2032_v34 = vadd.f32 %v1972_v31, %v1780_v20  ;;  %v1723_v10 = vpop.f32.mrf.mxu1 }
 0x1f0   : > { %v2354_v15 = vpop.f32.mrf.mxu3  ;;  %v1781_v12 = vadd.f32 %v1723_v10, %v3763_v51  ;;  %v1648_v51 = vsel %vm808_vm3, %v1645_v0, %v1647_v2 }
 0x1f1   : > { %v2404_v17 = vadd.f32 %v4071_v29, %v2032_v34  ;;  %v2534_v49 = vpop.f32.mrf.mxu0 }
 0x1f2   : > { %3005 = vmatmul.msk.bf16.gmra.mxu1 %vm275_vm1, %v1646_v18 }
 0x1f3   : > { %v2591_v63 = vadd.f32 %v2531_v33, %v2404_v17  ;;  %3076 = vmatmul.msk.bf16.gmra.mxu2 %vm275_vm1, %v3228_v47 }
 0x1f4   : > { %3158 = vmatmul.msk.bf16.gmra.mxu0 %vm275_vm1, %v2457_v62 }
 0x1f5   : > { %2619 = vst [vmem:[%s4036_s16 + $0x38] sm:$0xff] %v2591_v63 }
 0x1f6   : > { %v1975_v6 = vpop.f32.mrf.mxu2 }
 0x1f7   : > { %v2033_v25 = vadd.f32 %v1975_v6, %v1781_v12  ;;  %v1725_v32 = vpop.f32.mrf.mxu1 }
 0x1f8   : > { %v2357_v61 = vpop.f32.mrf.mxu3  ;;  %v1782_v38 = vadd.f32 %v1725_v32, %v3775_v19 }
 0x1f9   : > { %v2405_v23 = vadd.f32 %v2347_v54, %v2033_v25  ;;  %v2536_v29 = vpop.f32.mrf.mxu0 }
 0x1fb   : > { %v2592_v41 = vadd.f32 %v2534_v49, %v2405_v23 }
 0x1fd   : > { %2620 = vst [vmem:[%s4036_s16 + $0x40] sm:$0xff] %v2592_v41 }
 0x1fe   : > { %v1977_v52 = vpop.f32.mrf.mxu2 }
 0x1ff   : > { %v2034_v55 = vadd.f32 %v1977_v52, %v1782_v38  ;;  %v1728_v9 = vpop.f32.mrf.mxu1 }
 0x200   : > { %v2359_v57 = vpop.f32.mrf.mxu3  ;;  %v1783_v19 = vadd.f32 %v1728_v9, %v3792_v44 }
 0x201   : > { %v2406_v40 = vadd.f32 %v2349_v36, %v2034_v55  ;;  %v2539_v54 = vpop.f32.mrf.mxu0 }
 0x202   : > { %3006 = vmatmul.msk.bf16.gmra.mxu1 %vm275_vm1, %v1648_v51 }
 0x203   : > { %v2593_v37 = vadd.f32 %v2536_v29, %v2406_v40  ;;  %3077 = vmatmul.msk.bf16.gmra.mxu2 %vm275_vm1, %v3229_v21 }
 0x204   : > { %3159 = vmatmul.msk.bf16.gmra.mxu0 %vm275_vm1, %v2459_v28 }
 0x205   : > { %2621 = vst [vmem:[%s4036_s16 + $0x48] sm:$0xff] %v2593_v37 }
 0x206   : > { %v1980_v13 = vpop.f32.mrf.mxu2 }
 0x207   : > { %v2035_v56 = vadd.f32 %v1980_v13, %v1783_v19  ;;  %v1730_v1 = vpop.f32.mrf.mxu1 }
 0x208   : > { %v1784_v43 = vadd.f32 %v1730_v1, %v3806_v5  ;;  %v2362_v33 = vpop.f32.mrf.mxu3 }
 0x209   : > { %v2407_v36 = vadd.f32 %v2352_v3, %v2035_v56  ;;  %v2541_v48 = vpop.f32.mrf.mxu0 }
 0x20b   : > { %v2594_v4 = vadd.f32 %v2539_v54, %v2407_v36 }
 0x20d   : > { %2622 = vst [vmem:[%s4036_s16 + $0x50] sm:$0xff] %v2594_v4 }
 0x20e   : > { %v1982_v26 = vpop.f32.mrf.mxu2 }
 0x20f   : > { %v2036_v59 = vadd.f32 %v1982_v26, %v1784_v43  ;;  %v1733_v0 = vpop.f32.mrf.mxu1 }
 0x210   : > { %v1785_v44 = vadd.f32 %v1733_v0, %v3819_v39  ;;  %v2364_v10 = vpop.f32.mrf.mxu3 }
 0x211   : > { %v2408_v20 = vadd.f32 %v2354_v15, %v2036_v59  ;;  %v2544_v27 = vpop.f32.mrf.mxu0 }
 0x213   : > { %v2595_v31 = vadd.f32 %v2541_v48, %v2408_v20 }
 0x215   : > { %2623 = vst [vmem:[%s4036_s16 + $0x58] sm:$0xff] %v2595_v31 }
 0x216   : > { %v1985_v34 = vpop.f32.mrf.mxu2 }
 0x217   : > { %v2037_v47 = vadd.f32 %v1985_v34, %v1785_v44  ;;  %v1735_v3 = vpop.f32.mrf.mxu1 }
 0x218   : > { %v1786_v5 = vadd.f32 %v1735_v3, %v3833_v45  ;;  %v2367_v25 = vpop.f32.mrf.mxu3 }
 0x219   : > { %v2409_v18 = vadd.f32 %v2357_v61, %v2037_v47  ;;  %v2546_v17 = vpop.f32.mrf.mxu0 }
 0x21b   : > { %v2596_v49 = vadd.f32 %v2544_v27, %v2409_v18 }
 0x21d   : > { %2624 = vst [vmem:[%s4036_s16 + $0x60] sm:$0xff] %v2596_v49 }
 0x21e   : > { %v1987_v62 = vpop.f32.mrf.mxu2 }
 0x21f   : > { %v2038_v63 = vadd.f32 %v1987_v62, %v1786_v5  ;;  %v1738_v15 = vpop.f32.mrf.mxu1 }
 0x220   : > { %v1787_v39 = vadd.f32 %v1738_v15, %v3846_v53  ;;  %v2369_v11 = vpop.f32.mrf.mxu3 }
 0x221   : > { %v2410_v12 = vadd.f32 %v2359_v57, %v2038_v63  ;;  %v2549_v6 = vpop.f32.mrf.mxu0 }
 0x223   : > { %v2597_v32 = vadd.f32 %v2546_v17, %v2410_v12 }
 0x225   : > { %2625 = vst [vmem:[%s4036_s16 + $0x68] sm:$0xff] %v2597_v32 }
 0x226   : > { %v1990_v23 = vpop.f32.mrf.mxu2 }
 0x227   : > { %v2039_v29 = vadd.f32 %v1990_v23, %v1787_v39  ;;  %v1740_v61 = vpop.f32.mrf.mxu1 }
 0x228   : > { %v1788_v45 = vadd.f32 %v1740_v61, %v3860_v16  ;;  %v2372_v28 = vpop.f32.mrf.mxu3 }
 0x229   : > { %v2411_v41 = vadd.f32 %v2362_v33, %v2039_v29  ;;  %v2551_v2 = vpop.f32.mrf.mxu0 }
 0x22b   : > { %v2598_v38 = vadd.f32 %v2549_v6, %v2411_v41 }
 0x22d   : > { %2626 = vst [vmem:[%s4036_s16 + $0x70] sm:$0xff] %v2598_v38 }
 0x22e   : > { %v1992_v52 = vpop.f32.mrf.mxu2 }
 0x22f   : > { %v2040_v55 = vadd.f32 %v1992_v52, %v1788_v45  ;;  %v1743_v21 = vpop.f32.mrf.mxu1 }
 0x230   : > { %v1789_v53 = vadd.f32 %v1743_v21, %v3873_v35  ;;  %v2374_v4 = vpop.f32.mrf.mxu3 }
 0x231   : > { %v2412_v9 = vadd.f32 %v2364_v10, %v2040_v55  ;;  %v2554_v51 = vpop.f32.mrf.mxu0 }
 0x233   : > { %v2599_v40 = vadd.f32 %v2551_v2, %v2412_v9 }
 0x235   : > { %2627 = vst [vmem:[%s4036_s16 + $0x78] sm:$0xff] %v2599_v40 }
 0x236   : > { %v1995_v54 = vpop.f32.mrf.mxu2 }
 0x237   : > { %v2041_v37 = vadd.f32 %v1995_v54, %v1789_v53  ;;  %v1745_v57 = vpop.f32.mrf.mxu1 }
 0x238   : > { %v1790_v16 = vadd.f32 %v1745_v57, %v3887_v58  ;;  %v2377_v44 = vpop.f32.mrf.mxu3 }
 0x239   : > { %v2413_v19 = vadd.f32 %v2367_v25, %v2041_v37  ;;  %v2556_v13 = vpop.f32.mrf.mxu0 }
 0x23b   : > { %v2600_v56 = vadd.f32 %v2554_v51, %v2413_v19 }
 0x23d   : > { %2628 = vst [vmem:[%s4036_s16 + $0x80] sm:$0xff] %v2600_v56 }
 0x23e   : > { %v1997_v1 = vpop.f32.mrf.mxu2 }
 0x23f   : > { %v2042_v36 = vadd.f32 %v1997_v1, %v1790_v16  ;;  %v1748_v48 = vpop.f32.mrf.mxu1 }
 0x240   : > { %v1791_v35 = vadd.f32 %v1748_v48, %v3900_v14  ;;  %v2379_v5 = vpop.f32.mrf.mxu3 }
 0x241   : > { %v2414_v43 = vadd.f32 %v2369_v11, %v2042_v36  ;;  %v2559_v26 = vpop.f32.mrf.mxu0 }
 0x243   : > { %v2601_v33 = vadd.f32 %v2556_v13, %v2414_v43 }
 0x245   : > { %2629 = vst [vmem:[%s4036_s16 + $0x88] sm:$0xff] %v2601_v33 }
 0x246   : > { %v2000_v59 = vpop.f32.mrf.mxu2 }
 0x247   : > { %v2043_v0 = vadd.f32 %v2000_v59, %v1791_v35  ;;  %v1750_v20 = vpop.f32.mrf.mxu1 }
 0x248   : > { %v1792_v58 = vadd.f32 %v1750_v20, %v3914_v30  ;;  %v2382_v39 = vpop.f32.mrf.mxu3 }
 0x249   : > { %v2415_v27 = vadd.f32 %v2372_v28, %v2043_v0  ;;  %v2561_v31 = vpop.f32.mrf.mxu0 }
 0x24b   : > { %v2602_v34 = vadd.f32 %v2559_v26, %v2415_v27 }
 0x24d   : > { %2630 = vst [vmem:[%s4036_s16 + $0x90] sm:$0xff] %v2602_v34 }
 0x24e   : > { %v2002_v47 = vpop.f32.mrf.mxu2 }
 0x24f   : > { %v2044_v3 = vadd.f32 %v2002_v47, %v1792_v58  ;;  %v1753_v10 = vpop.f32.mrf.mxu1 }
 0x250   : > { %v1793_v14 = vadd.f32 %v1753_v10, %v3927_v22  ;;  %v2384_v52 = vpop.f32.mrf.mxu3 }
 0x251   : > { %v2416_v18 = vadd.f32 %v2374_v4, %v2044_v3  ;;  %v2564_v17 = vpop.f32.mrf.mxu0 }
 0x253   : > { %v2603_v49 = vadd.f32 %v2561_v31, %v2416_v18 }
 0x255   : > { %2631 = vst [vmem:[%s4036_s16 + $0x98] sm:$0xff] %v2603_v49 }
 0x256   : > { %v2005_v62 = vpop.f32.mrf.mxu2 }
 0x257   : > { %v2045_v63 = vadd.f32 %v2005_v62, %v1793_v14  ;;  %v1755_v15 = vpop.f32.mrf.mxu1 }
 0x258   : > { %v1794_v30 = vadd.f32 %v1755_v15, %v3941_v60  ;;  %v2387_v28 = vpop.f32.mrf.mxu3 }
 0x259   : > { %v2417_v12 = vadd.f32 %v2377_v44, %v2045_v63  ;;  %v2566_v6 = vpop.f32.mrf.mxu0 }
 0x25b   : > { %v2604_v25 = vadd.f32 %v2564_v17, %v2417_v12 }
 0x25d   : > { %2632 = vst [vmem:[%s4036_s16 + $0xa0] sm:$0xff] %v2604_v25 }
 0x25e   : > { %v2007_v32 = vpop.f32.mrf.mxu2 }
 0x25f   : > { %v2046_v23 = vadd.f32 %v2007_v32, %v1794_v30  ;;  %v1758_v29 = vpop.f32.mrf.mxu1 }
 0x260   : > { %v1795_v22 = vadd.f32 %v1758_v29, %v3954_v42  ;;  %v2389_v36 = vpop.f32.mrf.mxu3 }
 0x261   : > { %v2418_v61 = vadd.f32 %v2379_v5, %v2046_v23  ;;  %v2569_v41 = vpop.f32.mrf.mxu0 }
 0x263   : > { %v2605_v2 = vadd.f32 %v2566_v6, %v2418_v61 }
 0x265   : > { %2633 = vst [vmem:[%s4036_s16 + $0xa8] sm:$0xff] %v2605_v2 }
 0x266   : > { %v2010_v38 = vpop.f32.mrf.mxu2 }
 0x267   : > { %v2047_v11 = vadd.f32 %v2010_v38, %v1795_v22  ;;  %v1760_v45 = vpop.f32.mrf.mxu1 }
 0x268   : > { %v1796_v60 = vadd.f32 %v1760_v45, %v3968_v50 }
 0x269   : > { %v2419_v55 = vadd.f32 %v2382_v39, %v2047_v11  ;;  %v2571_v21 = vpop.f32.mrf.mxu0 }
 0x26b   : > { %v2606_v9 = vadd.f32 %v2569_v41, %v2419_v55 }
 0x26d   : > { %2634 = vst [vmem:[%s4036_s16 + $0xb0] sm:$0xff] %v2606_v9 }
 0x26e   : > { %v2012_v51 = vpop.f32.mrf.mxu2 }
 0x26f   : > { %v2048_v40 = vadd.f32 %v2012_v51, %v1796_v60  ;;  %v1763_v53 = vpop.f32.mrf.mxu1 }
 0x270   : > { %v1797_v42 = vadd.f32 %v1763_v53, %v3981_v46  ;;  %v2392_v46 = vpop.f32.mrf.mxu3 }
 0x271   : > { %v2420_v54 = vadd.f32 %v2384_v52, %v2048_v40  ;;  %v2574_v57 = vpop.f32.mrf.mxu0 }
 0x273   : > { %v2607_v37 = vadd.f32 %v2571_v21, %v2420_v54 }
 0x275   : > { %2635 = vst [vmem:[%s4036_s16 + $0xb8] sm:$0xff] %v2607_v37 }
 0x276   : > { %v2015_v19 = vpop.f32.mrf.mxu2 }
 0x277   : > { %v2049_v13 = vadd.f32 %v2015_v19, %v1797_v42  ;;  %v1765_v56 = vpop.f32.mrf.mxu1 }
 0x278   : > { %v1798_v50 = vadd.f32 %v1765_v56, %v3995_v24  ;;  %v2394_v3 = vpop.f32.mrf.mxu3 }
 0x279   : > { %v2421_v16 = vadd.f32 %v2387_v28, %v2049_v13  ;;  %v2576_v48 = vpop.f32.mrf.mxu0 }
 0x27b   : > { %v2608_v1 = vadd.f32 %v2574_v57, %v2421_v16 }
 0x27d   : > { %2636 = vst [vmem:[%s4036_s16 + $0xc0] sm:$0xff] %v2608_v1 }
 0x27e   : > { %v2017_v4 = vpop.f32.mrf.mxu2 }
 0x27f   : > { %v2050_v43 = vadd.f32 %v2017_v4, %v1798_v50  ;;  %v1768_v26 = vpop.f32.mrf.mxu1 }
 0x280   : > { %v1799_v59 = vadd.f32 %v1768_v26, %v4008_v7 }
 0x281   : > { %v2422_v33 = vadd.f32 %v2389_v36, %v2050_v43  ;;  %v2579_v27 = vpop.f32.mrf.mxu0 }
 0x283   : > { %v2609_v35 = vadd.f32 %v2576_v48, %v2422_v33 }
 0x285   : > { %2637 = vst [vmem:[%s4036_s16 + $0xc8] sm:$0xff] %v2609_v35 }
 0x286   : > { %v2020_v0 = vpop.f32.mrf.mxu2 }
 0x287   : > { %v2051_v20 = vadd.f32 %v2020_v0, %v1799_v59  ;;  %v1770_v44 = vpop.f32.mrf.mxu1 }
 0x288   : > { %v1800_v24 = vadd.f32 %v1770_v44, %v4021_v8 }
 0x289   : > { %v2423_v31 = vadd.f32 %v2392_v46, %v2051_v20  ;;  %v2581_v18 = vpop.f32.mrf.mxu0 }
 0x28b   : > { %v2610_v34 = vadd.f32 %v2579_v27, %v2423_v31 }
 0x28d   : > { %2638 = vst [vmem:[%s4036_s16 + $0xd0] sm:$0xff] %v2610_v34 }
 0x28e   : > { %v2022_v58 = vpop.f32.mrf.mxu2 }
 0x28f   : > { %v2052_v47 = vadd.f32 %v2022_v58, %v1800_v24 }
 0x291   : > { %v2424_v10 = vadd.f32 %v2394_v3, %v2052_v47 }
 0x293   : > { %v2611_v17 = vadd.f32 %v2581_v18, %v2424_v10 }
 0x295   : > { %2639 = vst [vmem:[%s4036_s16 + $0xd8] sm:$0xff] %v2611_v17 }
 0x296 PF: > { %s13_s12 = sadd.s32 1, %s3286_s12  }
 0x297   : > { %p10_p4 = scmp.ge.s32.totalorder %s13_s12, 4  }
 0x299   :  { %12 = sbr.rel (!%p10_p4) target bundleno = 1 (0x1), region = 70 }

</bundles_post_ra>
